<compile_context>
chip_gen: v7x
topology: tpu7x:2x2x1
jax: 0.10.0
libtpu: 0.0.40
codegen_flags: <defaults>
</compile_context>

<pallas_src>
import functools

import numpy as np

import jax
import jax.numpy as jnp
from jax.experimental import pallas as pl
from jax.experimental.pallas import tpu as pltpu

MIN_LEVEL_WIDTH = 128  # lane-aligned level padding (also the sel contraction dim)


# ----------------------------------------------------------------------------
# Pallas kernel: one grid step == one tree level (all nodes at that depth).
#   x_ref      : (W, m)      input_h of every node at this level (padded rows=0)
#   sel_ref    : (W, W)      one-hot parent-select matrix (row r picks parent row)
#   rc/rh_ref  : (1, m)      root state_top (resident)
#   wx/wh_ref  : (m, 4m)     ifoux / ifouh weights, stored (in, out) (resident)
#   b_ref      : (1, 4m)     ifoux_b + ifouh_b (resident)
#   out_ref    : (W, 2m)     fused [c | h] for this level
#   prev_c/h   : (W, m)      VMEM scratch carrying the previous level's state
# ----------------------------------------------------------------------------
def _tree_kernel(x_ref, sel_ref, rc_ref, rh_ref, wx_ref, wh_ref, b_ref,
                 out_ref, prev_c_ref, prev_h_ref):
    m = x_ref.shape[-1]

    # Level 0: every node's parent is the root — seed the carried state.
    @pl.when(pl.program_id(0) == 0)
    def _():
        prev_c_ref[...] = jnp.broadcast_to(rc_ref[...], prev_c_ref.shape)
        prev_h_ref[...] = jnp.broadcast_to(rh_ref[...], prev_h_ref.shape)

    # Parent gather as an MXU matmul against the host-built one-hot table.
    sel = sel_ref[...]
    parent_c = jnp.dot(sel, prev_c_ref[...], preferred_element_type=jnp.float32)
    parent_h = jnp.dot(sel, prev_h_ref[...], preferred_element_type=jnp.float32)

    # Fused gate pre-activation: ifou = x @ Wx + parent_h @ Wh + (bx + bh).
    ifou = (jnp.dot(x_ref[...], wx_ref[...], preferred_element_type=jnp.float32)
            + jnp.dot(parent_h, wh_ref[...], preferred_element_type=jnp.float32)
            + b_ref[...])

    # The reference module applies sigmoid to ALL four gates (including u).
    # sigmoid(x) = 0.5 * tanh(0.5 * x) + 0.5  -> one EUP pass per element.
    gates = 0.5 * jnp.tanh(0.5 * ifou) + 0.5
    i = gates[:, 0 * m:1 * m]
    f = gates[:, 1 * m:2 * m]
    o = gates[:, 2 * m:3 * m]
    u = gates[:, 3 * m:4 * m]

    c = i * u + f * parent_c
    h = o * jnp.tanh(c)

    prev_c_ref[...] = c          # carry to the next level
    prev_h_ref[...] = h
    out_ref[:, :m] = c           # fused [c | h] output block
    out_ref[:, m:] = h


def _bucket(n, minimum):
    n = max(int(n), int(minimum))
    return 1 << (n - 1).bit_length()


@functools.lru_cache(maxsize=None)
def _build_tree_call(num_levels, width, mem_dim):
    m = mem_dim
    call = pl.pallas_call(
        _tree_kernel,
        out_shape=jax.ShapeDtypeStruct((num_levels * width, 2 * m), jnp.float32),
        grid=(num_levels,),
        in_specs=[
            pl.BlockSpec((width, m), lambda l: (l, 0)),        # input_h (streamed)
            pl.BlockSpec((width, width), lambda l: (l, 0)),    # parent select (streamed)
            pl.BlockSpec((1, m), lambda l: (0, 0)),            # root c_top (resident)
            pl.BlockSpec((1, m), lambda l: (0, 0)),            # root h_top (resident)
            pl.BlockSpec((m, 4 * m), lambda l: (0, 0)),        # ifoux W (resident)
            pl.BlockSpec((m, 4 * m), lambda l: (0, 0)),        # ifouh W (resident)
            pl.BlockSpec((1, 4 * m), lambda l: (0, 0)),        # fused bias (resident)
        ],
        out_specs=pl.BlockSpec((width, 2 * m), lambda l: (l, 0)),
        scratch_shapes=[pltpu.VMEM((width, m), jnp.float32),   # prev-level c
                        pltpu.VMEM((width, m), jnp.float32)],  # prev-level h
        compiler_params=pltpu.CompilerParams(
            dimension_semantics=("arbitrary",)),               # levels are sequential
    )

    @jax.jit
    def run(x, sel, root_c, root_h, wrx_w, wrx_b, wrh_w, wrh_b, wx, wh, b):
        # Root transform: two (1,m)x(m,m) matmuls — plain jnp, fused into the
        # same jit dispatch as the whole-tree kernel.
        rc = root_c @ wrx_w + wrx_b
        rh = root_h @ wrh_w + wrh_b
        ch = call(x, sel, rc, rh, wx, wh, b)
        return rc, rh, ch[:, :m], ch[:, m:]

    return run


# ----------------------------------------------------------------------------
# Tree object + module wrapper (host-side glue)
# ----------------------------------------------------------------------------
class Tree:
    def __init__(self, state):
        self.parent = None
        self.children = []
        self.state = state          # (c, h), each (1, mem_dim)
        self._top = None
        self._top_src = None

    def add_child(self, child):
        child.parent = self
        self.children.append(child)

    @property
    def num_children(self):
        return len(self.children)

    # state_top is evaluated lazily: forward() only records (level tensors, row)
    # so the hot path does zero per-node device slicing.
    def set_lazy_top(self, c_all, h_all, row):
        self._top = None
        self._top_src = (c_all, h_all, row)

    @property
    def state_top(self):
        if self._top is None and self._top_src is not None:
            c_all, h_all, r = self._top_src
            self._top = (c_all[r:r + 1], h_all[r:r + 1])
        return self._top

    @state_top.setter
    def state_top(self, value):
        self._top = value
        self._top_src = None


def _level_order(tree):
    levels, frontier = [], list(tree.children)
    while frontier:
        levels.append(frontier)
        frontier = [ch for nd in frontier for ch in nd.children]
    return levels


class TopDownTreeLSTMPallas:
    def __init__(self, in_dim, mem_dim, key):
        assert mem_dim % 128 == 0, "mem_dim must be lane-aligned (multiple of 128)"
        self.in_dim = in_dim
        self.mem_dim = mem_dim
        ks = jax.random.split(key, 8)

        def lin(kw, kb, fan_in, fan_out):
            # Deterministic init, stored "already transposed" as (in, out):
            # y = x @ W + b  ==  torch's x @ W.T + b
            w = jax.random.normal(kw, (fan_in, fan_out), jnp.float32) * 0.05
            b = jax.random.normal(kb, (1, fan_out), jnp.float32) * 0.05
            return w, b

        self.wrootx_w, self.wrootx_b = lin(ks[0], ks[1], mem_dim, mem_dim)
        self.wrooth_w, self.wrooth_b = lin(ks[2], ks[3], mem_dim, mem_dim)
        self.ifoux_w, self.ifoux_b = lin(ks[4], ks[5], mem_dim, 4 * mem_dim)
        self.ifouh_w, self.ifouh_b = lin(ks[6], ks[7], mem_dim, 4 * mem_dim)
        self.b_fused = self.ifoux_b + self.ifouh_b   # biases pre-summed

    # ------------------------------------------------------------------ #
    # Pallas forward: ONE pallas_call for the whole tree.
    # ------------------------------------------------------------------ #
    def forward(self, tree):
        m = self.mem_dim
        levels = _level_order(tree)

        if not levels:  # lone root
            tree.state_top = (tree.state[0] @ self.wrootx_w + self.wrootx_b,
                              tree.state[1] @ self.wrooth_w + self.wrooth_b)
            return tree

        num_levels = len(levels)
        max_w = max(len(lv) for lv in levels)
        W = _bucket(max_w, MIN_LEVEL_WIDTH)   # pow2 bucketing caps recompiles
        Lp = _bucket(num_levels, 1)

        # Host-built parent one-hot select table + flat slot map (single pass of
        # Python pointer chasing; zero per-node device ops).  Padded rows and
        # dummy levels get all-zero select rows -> finite garbage, never read.
        sel = np.zeros((Lp, W, W), np.float32)
        order, slots = [], []
        for l, lv in enumerate(levels):
            if l == 0:
                parent_row = {id(tree): 0}
            else:
                parent_row = {id(p): r for r, p in enumerate(levels[l - 1])}
            for r, nd in enumerate(lv):
                sel[l, r, parent_row[id(nd.parent)]] = 1.0
                order.append(nd)
                slots.append(l * W + r)

        slots_np = np.asarray(slots, dtype=np.int32)
        flat_h = jnp.concatenate([nd.state[1] for nd in order], axis=0)  # one op
        x = jnp.zeros((Lp * W, m), jnp.float32).at[slots_np].set(flat_h)  # one op
        sel_j = jnp.asarray(sel.reshape(Lp * W, W))

        run = _build_tree_call(Lp, W, m)
        rc, rh, c_all, h_all = run(
            x, sel_j, tree.state[0], tree.state[1],
            self.wrootx_w, self.wrootx_b, self.wrooth_w, self.wrooth_b,
            self.ifoux_w, self.ifouh_w, self.b_fused)

        tree.state_top = (rc, rh)
        for nd, s in zip(order, slots):          # python-only; sliced lazily on read
            nd.set_lazy_top(c_all, h_all, s)
        return tree

    # ------------------------------------------------------------------ #
    # Pure-JAX reference (no Pallas, unfused) for verification.
    # ------------------------------------------------------------------ #
    def forward_ref(self, tree):
        if tree.parent is None:
            c, h = tree.state
            tree.state_top_ref = (c @ self.wrootx_w + self.wrootx_b,
                                  h @ self.wrooth_w + self.wrooth_b)
        else:
            _, input_h = tree.state
            pc, ph = tree.parent.state_top_ref
            ifou = (input_h @ self.ifoux_w + self.ifoux_b
                    + ph @ self.ifouh_w + self.ifouh_b)
            m = self.mem_dim
            i = jax.nn.sigmoid(ifou[:, 0:m])
            f = jax.nn.sigmoid(ifou[:, m:2 * m])
            o = jax.nn.sigmoid(ifou[:, 2 * m:3 * m])
            u = jax.nn.sigmoid(ifou[:, 3 * m:4 * m])
            c = i * u + f * pc
            tree.state_top_ref = (c, o * jnp.tanh(c))
        for child in tree.children:
            self.forward_ref(child)
        return tree


# ----------------------------------------------------------------------------
# Demo / self-test
# ----------------------------------------------------------------------------
def _build_demo_tree(key, mem_dim, depth=3, branching=2):
    def new_state(k):
        kc, kh = jax.random.split(k)
        return (jax.random.normal(kc, (1, mem_dim), jnp.float32),
                jax.random.normal(kh, (1, mem_dim), jnp.float32))

    key, sub = jax.random.split(key)
    root = Tree(new_state(sub))
    frontier = [root]
    for _ in range(depth):
        nxt = []
        for node in frontier:
            for _ in range(branching):
                key, sub = jax.random.split(key)
                child = Tree(new_state(sub))
                node.add_child(child)
                nxt.append(child)
        frontier = nxt
    return root


def _collect_nodes(tree):
    out = [tree]
    for ch in tree.children:
        out.extend(_collect_nodes(ch))
    return out


if __name__ == "__main__":
    key = jax.random.PRNGKey(0)
    k_param, k_tree = jax.random.split(key)

    mem_dim = 128
    model = TopDownTreeLSTMPallas(in_dim=mem_dim, mem_dim=mem_dim, key=k_param)
    tree = _build_demo_tree(k_tree, mem_dim, depth=3, branching=2)  # 15 nodes, 3 levels

    model.forward(tree)       # single pallas_call over all levels
    model.forward_ref(tree)   # recursive pure-JAX reference

    for nd in _collect_nodes(tree):
        gc, gh = nd.state_top
        wc, wh = nd.state_top_ref
        gc = jax.block_until_ready(gc)
        gh = jax.block_until_ready(gh)
        assert jnp.allclose(gc, wc, atol=1e-4, rtol=1e-4), "c mismatch"
        assert jnp.allclose(gh, wh, atol=1e-4, rtol=1e-4), "h mismatch"

    print("KERNEL_OK")
</pallas_src>

<mosaic_0001>
module attributes {stable_mosaic.version = 11 : i64} {
  func.func @_tree_kernel(%arg0: i32, %arg1: memref<128x128xf32, #tpu.memory_space<vmem>>, %arg2: memref<128x128xf32, #tpu.memory_space<vmem>>, %arg3: memref<1x128xf32, #tpu.memory_space<vmem>>, %arg4: memref<1x128xf32, #tpu.memory_space<vmem>>, %arg5: memref<128x512xf32, #tpu.memory_space<vmem>>, %arg6: memref<128x512xf32, #tpu.memory_space<vmem>>, %arg7: memref<1x512xf32, #tpu.memory_space<vmem>>, %arg8: memref<128x256xf32, #tpu.memory_space<vmem>>, %arg9: memref<128x128xf32, #tpu.memory_space<vmem>>, %arg10: memref<128x128xf32, #tpu.memory_space<vmem>>) attributes {dimension_semantics = [#tpu.dimension_semantics<arbitrary>], iteration_bounds = array<i64: 4>, scalar_prefetch = 0 : i64, scratch_operands = 2 : i64, tpu.core_type = #tpu.core_type<tc>, window_params = [{transform_indices = @transform_0, window_bounds = array<i64: 128, 128>}, {transform_indices = @transform_1, window_bounds = array<i64: 128, 128>}, {pipeline_mode = #tpu.pipeline_mode<synchronous>, transform_indices = @transform_2, window_bounds = array<i64: 1, 128>}, {pipeline_mode = #tpu.pipeline_mode<synchronous>, transform_indices = @transform_3, window_bounds = array<i64: 1, 128>}, {pipeline_mode = #tpu.pipeline_mode<synchronous>, transform_indices = @transform_4, window_bounds = array<i64: 128, 512>}, {pipeline_mode = #tpu.pipeline_mode<synchronous>, transform_indices = @transform_5, window_bounds = array<i64: 128, 512>}, {pipeline_mode = #tpu.pipeline_mode<synchronous>, transform_indices = @transform_6, window_bounds = array<i64: 1, 512>}, {transform_indices = @transform_7, window_bounds = array<i64: 128, 256>}]} {
    %c0_i32 = arith.constant 0 : i32
    %0 = arith.cmpi eq, %arg0, %c0_i32 : i32
    %1 = arith.extui %0 : i1 to i32
    %c0_i32_0 = arith.constant 0 : i32
    %2 = arith.cmpi ne, %1, %c0_i32_0 : i32
    scf.if %2 {
      %c0_27 = arith.constant 0 : index
      %c0_28 = arith.constant 0 : index
      %37 = vector.load %arg3[%c0_27, %c0_28] : memref<1x128xf32, #tpu.memory_space<vmem>>, vector<1x128xf32>
      %38 = vector.shape_cast %37 : vector<1x128xf32> to vector<1x128xf32>
      %39 = vector.broadcast %38 : vector<1x128xf32> to vector<128x128xf32>
      %c0_29 = arith.constant 0 : index
      %c0_30 = arith.constant 0 : index
      %40 = vector.load %arg9[%c0_29, %c0_30] : memref<128x128xf32, #tpu.memory_space<vmem>>, vector<128x128xf32>
      tpu.vector_store %arg9[%c0_29, %c0_30], %39 {strides = array<i32>} : memref<128x128xf32, #tpu.memory_space<vmem>>, vector<128x128xf32>,
      %c0_31 = arith.constant 0 : index
      %c0_32 = arith.constant 0 : index
      %41 = vector.load %arg4[%c0_31, %c0_32] : memref<1x128xf32, #tpu.memory_space<vmem>>, vector<1x128xf32>
      %42 = vector.shape_cast %41 : vector<1x128xf32> to vector<1x128xf32>
      %43 = vector.broadcast %42 : vector<1x128xf32> to vector<128x128xf32>
      %c0_33 = arith.constant 0 : index
      %c0_34 = arith.constant 0 : index
      %44 = vector.load %arg10[%c0_33, %c0_34] : memref<128x128xf32, #tpu.memory_space<vmem>>, vector<128x128xf32>
      tpu.vector_store %arg10[%c0_33, %c0_34], %43 {strides = array<i32>} : memref<128x128xf32, #tpu.memory_space<vmem>>, vector<128x128xf32>,
    } else {
    }
    %c0 = arith.constant 0 : index
    %c0_1 = arith.constant 0 : index
    %3 = vector.load %arg2[%c0, %c0_1] : memref<128x128xf32, #tpu.memory_space<vmem>>, vector<128x128xf32>
    %c0_2 = arith.constant 0 : index
    %c0_3 = arith.constant 0 : index
    %4 = vector.load %arg9[%c0_2, %c0_3] : memref<128x128xf32, #tpu.memory_space<vmem>>, vector<128x128xf32>
    %cst = arith.constant dense<0.000000e+00> : vector<128x128xf32>
    %5 = tpu.matmul %3, %4, %cst {dimension_numbers = #tpu.dot_dimension_numbers<[1], [0], [0], [1], [0, 0, 1, 1], [], []>} : vector<128x128xf32>, vector<128x128xf32>, vector<128x128xf32> -> vector<128x128xf32>
    %c0_4 = arith.constant 0 : index
    %c0_5 = arith.constant 0 : index
    %6 = vector.load %arg10[%c0_4, %c0_5] : memref<128x128xf32, #tpu.memory_space<vmem>>, vector<128x128xf32>
    %cst_6 = arith.constant dense<0.000000e+00> : vector<128x128xf32>
    %7 = tpu.matmul %3, %6, %cst_6 {dimension_numbers = #tpu.dot_dimension_numbers<[1], [0], [0], [1], [0, 0, 1, 1], [], []>} : vector<128x128xf32>, vector<128x128xf32>, vector<128x128xf32> -> vector<128x128xf32>
    %c0_7 = arith.constant 0 : index
    %c0_8 = arith.constant 0 : index
    %8 = vector.load %arg1[%c0_7, %c0_8] : memref<128x128xf32, #tpu.memory_space<vmem>>, vector<128x128xf32>
    %c0_9 = arith.constant 0 : index
    %c0_10 = arith.constant 0 : index
    %9 = vector.load %arg5[%c0_9, %c0_10] : memref<128x512xf32, #tpu.memory_space<vmem>>, vector<128x512xf32>
    %cst_11 = arith.constant dense<0.000000e+00> : vector<128x512xf32>
    %10 = tpu.matmul %8, %9, %cst_11 {dimension_numbers = #tpu.dot_dimension_numbers<[1], [0], [0], [1], [0, 0, 1, 1], [], []>} : vector<128x128xf32>, vector<128x512xf32>, vector<128x512xf32> -> vector<128x512xf32>
    %c0_12 = arith.constant 0 : index
    %c0_13 = arith.constant 0 : index
    %11 = vector.load %arg6[%c0_12, %c0_13] : memref<128x512xf32, #tpu.memory_space<vmem>>, vector<128x512xf32>
    %cst_14 = arith.constant dense<0.000000e+00> : vector<128x512xf32>
    %12 = tpu.matmul %7, %11, %cst_14 {dimension_numbers = #tpu.dot_dimension_numbers<[1], [0], [0], [1], [0, 0, 1, 1], [], []>} : vector<128x128xf32>, vector<128x512xf32>, vector<128x512xf32> -> vector<128x512xf32>
    %13 = arith.addf %10, %12 : vector<128x512xf32>
    %c0_15 = arith.constant 0 : index
    %c0_16 = arith.constant 0 : index
    %14 = vector.load %arg7[%c0_15, %c0_16] : memref<1x512xf32, #tpu.memory_space<vmem>>, vector<1x512xf32>
    %15 = vector.broadcast %14 : vector<1x512xf32> to vector<128x512xf32>
    %16 = arith.addf %13, %15 : vector<128x512xf32>
    %cst_17 = arith.constant 5.000000e-01 : f32
    %17 = vector.broadcast %cst_17 : f32 to vector<128x512xf32>
    %18 = arith.mulf %17, %16 : vector<128x512xf32>
    %19 = math.tanh %18 : vector<128x512xf32>
    %cst_18 = arith.constant 5.000000e-01 : f32
    %20 = vector.broadcast %cst_18 : f32 to vector<128x512xf32>
    %21 = arith.mulf %20, %19 : vector<128x512xf32>
    %cst_19 = arith.constant 5.000000e-01 : f32
    %22 = vector.broadcast %cst_19 : f32 to vector<128x512xf32>
    %23 = arith.addf %21, %22 : vector<128x512xf32>
    %24 = vector.extract_strided_slice %23 {offsets = [0, 0], sizes = [128, 128], strides = [1, 1]} : vector<128x512xf32> to vector<128x128xf32>
    %25 = vector.extract_strided_slice %23 {offsets = [0, 128], sizes = [128, 128], strides = [1, 1]} : vector<128x512xf32> to vector<128x128xf32>
    %26 = vector.extract_strided_slice %23 {offsets = [0, 256], sizes = [128, 128], strides = [1, 1]} : vector<128x512xf32> to vector<128x128xf32>
    %27 = vector.extract_strided_slice %23 {offsets = [0, 384], sizes = [128, 128], strides = [1, 1]} : vector<128x512xf32> to vector<128x128xf32>
    %28 = arith.mulf %24, %27 : vector<128x128xf32>
    %29 = arith.mulf %25, %5 : vector<128x128xf32>
    %30 = arith.addf %28, %29 : vector<128x128xf32>
    %31 = math.tanh %30 : vector<128x128xf32>
    %32 = arith.mulf %26, %31 : vector<128x128xf32>
    %c0_20 = arith.constant 0 : index
    %c0_21 = arith.constant 0 : index
    %33 = vector.load %arg9[%c0_20, %c0_21] : memref<128x128xf32, #tpu.memory_space<vmem>>, vector<128x128xf32>
    tpu.vector_store %arg9[%c0_20, %c0_21], %30 {strides = array<i32>} : memref<128x128xf32, #tpu.memory_space<vmem>>, vector<128x128xf32>,
    %c0_22 = arith.constant 0 : index
    %c0_23 = arith.constant 0 : index
    %34 = vector.load %arg10[%c0_22, %c0_23] : memref<128x128xf32, #tpu.memory_space<vmem>>, vector<128x128xf32>
    tpu.vector_store %arg10[%c0_22, %c0_23], %32 {strides = array<i32>} : memref<128x128xf32, #tpu.memory_space<vmem>>, vector<128x128xf32>,
    %c0_24 = arith.constant 0 : index
    %c0_25 = arith.constant 0 : index
    %35 = vector.load %arg8[%c0_24, %c0_25] : memref<128x256xf32, #tpu.memory_space<vmem>>, vector<128x128xf32>
    tpu.vector_store %arg8[%c0_24, %c0_25], %30 {strides = array<i32>} : memref<128x256xf32, #tpu.memory_space<vmem>>, vector<128x128xf32>,
    %c0_26 = arith.constant 0 : index
    %c128 = arith.constant 128 : index
    %36 = vector.load %arg8[%c0_26, %c128] : memref<128x256xf32, #tpu.memory_space<vmem>>, vector<128x128xf32>
    tpu.vector_store %arg8[%c0_26, %c128], %32 {strides = array<i32>} : memref<128x256xf32, #tpu.memory_space<vmem>>, vector<128x128xf32>,
    return
  }
  func.func @transform_0(%arg0: i32) -> (i32, i32) {
    %c0_i32 = arith.constant 0 : i32
    %c0_i32_0 = arith.constant 0 : i32
    return %arg0, %c0_i32 : i32, i32
  }
  func.func @transform_1(%arg0: i32) -> (i32, i32) {
    %c0_i32 = arith.constant 0 : i32
    %c0_i32_0 = arith.constant 0 : i32
    return %arg0, %c0_i32 : i32, i32
  }
  func.func @transform_2(%arg0: i32) -> (i32, i32) {
    %c0_i32 = arith.constant 0 : i32
    %c0_i32_0 = arith.constant 0 : i32
    %c0_i32_1 = arith.constant 0 : i32
    return %c0_i32, %c0_i32_0 : i32, i32
  }
  func.func @transform_3(%arg0: i32) -> (i32, i32) {
    %c0_i32 = arith.constant 0 : i32
    %c0_i32_0 = arith.constant 0 : i32
    %c0_i32_1 = arith.constant 0 : i32
    return %c0_i32, %c0_i32_0 : i32, i32
  }
  func.func @transform_4(%arg0: i32) -> (i32, i32) {
    %c0_i32 = arith.constant 0 : i32
    %c0_i32_0 = arith.constant 0 : i32
    %c0_i32_1 = arith.constant 0 : i32
    return %c0_i32, %c0_i32_0 : i32, i32
  }
  func.func @transform_5(%arg0: i32) -> (i32, i32) {
    %c0_i32 = arith.constant 0 : i32
    %c0_i32_0 = arith.constant 0 : i32
    %c0_i32_1 = arith.constant 0 : i32
    return %c0_i32, %c0_i32_0 : i32, i32
  }
  func.func @transform_6(%arg0: i32) -> (i32, i32) {
    %c0_i32 = arith.constant 0 : i32
    %c0_i32_0 = arith.constant 0 : i32
    %c0_i32_1 = arith.constant 0 : i32
    return %c0_i32, %c0_i32_0 : i32, i32
  }
  func.func @transform_7(%arg0: i32) -> (i32, i32) {
    %c0_i32 = arith.constant 0 : i32
    %c0_i32_0 = arith.constant 0 : i32
    return %arg0, %c0_i32 : i32, i32
  }
}

</mosaic_0001>

<bundles_post_ra>
// kernel: run.1
= control target key start
LH: loop header
LB: loop body
LE: loop exit
PB: predicated region body
PF: predicated region fallthrough
CT: control target
= control target key end

     0   :  { %s3761_s0 = inlined_call_operand.hbm [shape: f32[512,128], index: 0, kind: input, shape index: {}]   ;;  %s3762_s1 = inlined_call_operand.hbm [shape: f32[512,128], index: 1, kind: input, shape index: {}]   ;;  %s3763_s2 = inlined_call_operand.vmem [shape: f32[1,128], index: 2, kind: input, shape index: {}]   ;;  %s3764_s3 = inlined_call_operand.vmem [shape: f32[1,128], index: 3, kind: input, shape index: {}]   ;;  %s3765_s4 = inlined_call_operand.hbm [shape: f32[128,512], index: 4, kind: input, shape index: {}]   ;;  %s3766_s5 = inlined_call_operand.hbm [shape: f32[128,512], index: 5, kind: input, shape index: {}]   ;;  %s3767_s6 = inlined_call_operand.vmem [shape: f32[1,512], index: 6, kind: input, shape index: {}]   ;;  %s3768_s7 = inlined_call_operand.vmem [shape: f32[512,256], index: 7, kind: output, shape index: {}]  }
   0x1   :  { %3772 = sst [smem:[#allocation15_spill]] %s3761_s0 }
   0x2   :  { %12 = vsyncpa [#allocation5], 0 }
   0x3   :  { %14 = vsyncpa [#allocation5 + $0x1], 0 }
   0x4   :  { %15 = vsyncpa [#allocation7], 0 }
   0x5   :  { %17 = vsyncpa [#allocation7 + $0x1], 0 }
   0x6   :  { %18 = vsyncpa [#allocation10], 0  ;;  %s3049_s24 = smov 0   ;;  %s3051_s25 = smov 0  }
   0x7   :  { %s3053_s26 = smov 0   ;;  %s3055_s27 = smov 0  }
   0x8 LB: > { %s3068_s28 = sadd.s32 4294967295, %s2998_s27   ;;  %p44_p0 = scmp.ne.s32.totalorder %s2990_s25, %s2986_s24  ;;  %s2998_s27 = sphi %s3055_s27, %s3788_s27   ;;  %s2994_s26 = sphi %s3053_s26, %s3787_s26   ;;  %s2990_s25 = sphi %s3051_s25, %s3786_s25   ;;  %s2986_s24 = sphi %s3049_s24, %s3785_s24  }
   0x9   : > { %p3769_p1 = scmp.eq.s32.totalorder %s3068_s28, 0  ;;  %p2148_p2 = scmp.ge.s32.totalorder %s2998_s27, 1 }
   0xa   : > { %p212_p3 = scmp.lt.s32.totalorder %s2998_s27, 5  ;;  %s3000_s8 = smov [#allocation8]  }
   0xb   : > { %p3077_p5 = por %p3769_p1, %p44_p0  ;;  %s230_s9 = sshll.u32 %s3000_s8, 4  ;;  %s231_s9 = int_to_ptr.vmem [resolvable:$true] %s230_s9 }
   0xc   : > { %p3081_p6 = pnand %p2148_p2, %p212_p3  ;;  %s3001_s11 = smov [#allocation9]  }
   0xd   : > { %s3773_s29 = scalar_select %p3077_p5, 1, 0 }
   0xe   : > { %s3774_s30 = scalar_select %p3081_p6, 1, 0 }
   0xf   : > { %p2618_p7 = pneg %p3081_p6  ;;  %s243_s12 = sshll.u32 %s3001_s11, 4  ;;  %s3093_s12 = int_to_ptr.vmem [resolvable:$true] %s243_s12 }
  0x10   : > { %s2836_s15 = scalar_lea.hbm %s3765_s4, 8192 }
  0x11   : > { %p3089_p8 = pnand %p2618_p7, %p3769_p1  ;;  %p2837_p9 = scmp.ne.s32.totalorder %s3765_s4, %s2836_s15 }
  0x12   : > { %p2843_p13 = scmp.lt.u32.totalorder %s2836_s15, %s3765_s4 }
  0x13   : > { %p2838_p10 = pneg %p3089_p8 }
  0x15   : > { %p2839_p11 = pnand %p2838_p10, %p2837_p9 }
  0x17   : > { %p2840_p12 = pneg %p2839_p11 }
  0x19   : > { %p2845_p0 = pnand %p2843_p13, %p2840_p12 }
  0x1b   : > { %2848 = shalt.err (!%p2845_p0)
}
  0x1c   : > { %s2849_s20 = scalar_lea.vmem %s231_s9, 8192  ;;  %p2857_p4 = scmp.lt.s32.totalorder %s231_s9, %s231_s9 }
  0x1d   : > { %p2850_p2 = scmp.ne.s32.totalorder %s231_s9, %s2849_s20  ;;  %p2858_p1 = scmp.lt.s32.totalorder %s2849_s20, %s2849_s20 }
  0x1f   : > { %p2852_p3 = pnand %p2850_p2, %p2838_p10  ;;  %p2859_p5 = por %p2858_p1, %p2857_p4 }
  0x21   : > { %p2853_p7 = pneg %p2852_p3 }
  0x23   : > { %p2860_p6 = pnand %p2859_p5, %p2853_p7 }
  0x25   : > { %2863 = shalt.err (!%p2860_p6)
}
  0x26   : > { %s3002_s21 = smov 512   ;;  %s3003_s22 = smov 32  }
  0x27   : > { %2621 = dma.hbm_to_vmem [thread:$0]  (!%p3089_p8), %s3765_s4, 8192, %s231_s9, [#allocation7], %s3002_s21, %s3002_s21, %s3003_s22  }
  0x28   : > { %s2864_s13 = scalar_lea.hbm %s3766_s5, 8192 }
  0x29   : > { %p2865_p9 = scmp.ne.s32.totalorder %s3766_s5, %s2864_s13  ;;  %p2871_p5 = scmp.lt.u32.totalorder %s2864_s13, %s3766_s5 }
  0x2b   : > { %p2867_p1 = pnand %p2865_p9, %p2838_p10 }
  0x2d   : > { %p2868_p4 = pneg %p2867_p1 }
  0x2f   : > { %p2873_p6 = pnand %p2871_p5, %p2868_p4 }
  0x31   : > { %2876 = shalt.err (!%p2873_p6)
}
  0x32   : > { %s2877_s9 = scalar_lea.vmem %s3093_s12, 8192  ;;  %p2885_p0 = scmp.lt.s32.totalorder %s3093_s12, %s3093_s12 }
  0x33   : > { %p2878_p11 = scmp.ne.s32.totalorder %s3093_s12, %s2877_s9  ;;  %p2886_p2 = scmp.lt.s32.totalorder %s2877_s9, %s2877_s9 }
  0x35   : > { %p2880_p12 = pnand %p2878_p11, %p2838_p10  ;;  %p2887_p3 = por %p2886_p2, %p2885_p0 }
  0x37   : > { %p2881_p13 = pneg %p2880_p12 }
  0x39   : > { %p2888_p7 = pnand %p2887_p3, %p2881_p13 }
  0x3b   : > { %2891 = shalt.err (!%p2888_p7)
}
  0x3c   : > { %2624 = dma.hbm_to_vmem [thread:$0]  (!%p3089_p8), %s3766_s5, 8192, %s3093_s12, [#allocation10], %s3002_s21, %s3002_s21, %s3003_s22  }
  0x3d   : > { %s3143_s20 = sadd.s32 1, %s2998_s27   ;;  %s31_s10 = sadd.s32 1, %s2994_s26 }
  0x3e   : > { %s28_s23 = ssub.s32 %s2998_s27, %s3143_s20  ;;  %p38_p10 = scmp.ne.s32.totalorder %s2994_s26, %s2990_s25 }
  0x3f   : > { %p29_p9 = scmp.eq.s32.totalorder %s28_s23, 0  ;;  %p39_p1 = scmp.eq.s32.totalorder %s2998_s27, 0 }
  0x40   : > { %p2634_p4 = scmp.lt.s32.totalorder %s2998_s27, 4  ;;  %s260_s24 = sand.u32 1, %s2994_s26  }
  0x41   : > { %s3154_s8 = scalar_select %p29_p9, %s2994_s26, %s31_s10  }
  0x42   : > { %p40_p5 = por %p39_p1, %p38_p10  ;;  %s3156_s11 = sshll.u32 %s260_s24, 7 }
  0x43   : > { %s2171_s13 = sshll.u32 %s2998_s27, 11  ;;  %s3776_s0 = sld [smem:[#allocation15_spill]] }
  0x44   : > { %s264_s22 = scalar_lea.vmem [#allocation4], %s3156_s11  ;;  %p3167_p8 = pnand %p2634_p4, %p40_p5 }
  0x45   : > { %s271_s15 = sshll.u32 %s264_s22, 4  ;;  %s3173_s17 = scalar_lea.sflag [#allocation5], %s260_s24  ;;  %s3171_s15 = int_to_ptr.vmem [resolvable:$true] %s271_s15 }
  0x46   : > { %p2894_p11 = pneg %p3167_p8 }
  0x49   : > { %s3164_s21 = scalar_lea.hbm %s3776_s0, %s2171_s13  ;;  %s2897_s10 = scalar_lea.hbm %s3776_s0, 8192 }
  0x4a   : > { %s2892_s9 = scalar_lea.hbm %s3164_s21, 2048  ;;  %p2898_p0 = scmp.lt.u32.totalorder %s3164_s21, %s3776_s0 }
  0x4b   : > { %p2893_p6 = scmp.ne.s32.totalorder %s3164_s21, %s2892_s9  ;;  %p2899_p2 = scmp.lt.u32.totalorder %s2897_s10, %s2892_s9 }
  0x4c   : > { %p2901_p7 = scmp.lt.u32.totalorder %s2892_s9, %s3164_s21 }
  0x4d   : > { %p2895_p12 = pnand %p2894_p11, %p2893_p6  ;;  %p2900_p3 = por %p2899_p2, %p2898_p0 }
  0x4f   : > { %p2896_p13 = pneg %p2895_p12  ;;  %p2902_p10 = por %p2901_p7, %p2900_p3 }
  0x51   : > { %p2903_p9 = pnand %p2902_p10, %p2896_p13 }
  0x53   : > { %2906 = shalt.err (!%p2903_p9)
}
  0x54   : > { %s2907_s24 = scalar_lea.vmem %s3171_s15, 2048  ;;  %s3004_s12 = smov [#allocation4]  }
  0x55   : > { %p2908_p1 = scmp.ne.s32.totalorder %s3171_s15, %s2907_s24  ;;  %s2912_s22 = sshll.u32 %s3004_s12, 4  ;;  %s2913_s22 = int_to_ptr.vmem [resolvable:$false] %s2912_s22 }
  0x56   : > { %s2914_s18 = scalar_lea.vmem %s2913_s22, 4096  ;;  %p2915_p6 = scmp.lt.s32.totalorder %s3171_s15, %s2913_s22 }
  0x57   : > { %p2910_p4 = pnand %p2908_p1, %p2894_p11  ;;  %p2916_p12 = scmp.lt.s32.totalorder %s2914_s18, %s2907_s24 }
  0x59   : > { %p2911_p5 = pneg %p2910_p4  ;;  %p2917_p0 = por %p2916_p12, %p2915_p6 }
  0x5b   : > { %p2918_p2 = pnand %p2917_p0, %p2911_p5 }
  0x5d   : > { %2921 = shalt.err (!%p2918_p2)
}
  0x5e   : > { %s3005_s9 = smov 128   ;;  %s3006_s19 = smov 8  }
  0x5f   : > { %2628 = dma.hbm_to_vmem [thread:$0]  (!%p3167_p8), %s3164_s21, 2048, %s3171_s15, %s3173_s17, %s3005_s9, %s3005_s9, %s3006_s19  }
  0x60   : > { %s3209_s14 = scalar_lea.hbm %s3762_s1, %s2171_s13  ;;  %s285_s24 = scalar_lea.vmem [#allocation6], %s3156_s11 }
  0x61   : > { %s292_s12 = sshll.u32 %s285_s24, 4  ;;  %s281_s22 = sand.u32 1, %s2998_s27   ;;  %s3213_s12 = int_to_ptr.vmem [resolvable:$true] %s292_s12 }
  0x62   : > { %s3215_s18 = scalar_lea.sflag [#allocation7], %s281_s22  ;;  %s2922_s0 = scalar_lea.hbm %s3209_s14, 2048 }
  0x63   : > { %p2923_p13 = scmp.ne.s32.totalorder %s3209_s14, %s2922_s0  ;;  %s2927_s15 = scalar_lea.hbm %s3762_s1, 8192 }
  0x64   : > { %p2928_p10 = scmp.lt.u32.totalorder %s3209_s14, %s3762_s1  ;;  %p2929_p9 = scmp.lt.u32.totalorder %s2927_s15, %s2922_s0 }
  0x65   : > { %p2925_p3 = pnand %p2923_p13, %p2894_p11  ;;  %p2931_p4 = scmp.lt.u32.totalorder %s2922_s0, %s3209_s14 }
  0x66   : > { %p2930_p1 = por %p2929_p9, %p2928_p10 }
  0x67   : > { %p2926_p7 = pneg %p2925_p3 }
  0x68   : > { %p2932_p5 = por %p2931_p4, %p2930_p1 }
  0x6a   : > { %p2933_p6 = pnand %p2932_p5, %p2926_p7 }
  0x6c   : > { %2936 = shalt.err (!%p2933_p6)
}
  0x6d   : > { %s2937_s27 = scalar_lea.vmem %s3213_s12, 2048  ;;  %s3007_s11 = smov [#allocation6]  }
  0x6e   : > { %p2938_p12 = scmp.ne.s32.totalorder %s3213_s12, %s2937_s27  ;;  %s2942_s23 = sshll.u32 %s3007_s11, 4  ;;  %s2943_s23 = int_to_ptr.vmem [resolvable:$false] %s2942_s23 }
  0x6f   : > { %s2944_s24 = scalar_lea.vmem %s2943_s23, 4096  ;;  %p2945_p13 = scmp.lt.s32.totalorder %s3213_s12, %s2943_s23 }
  0x70   : > { %p2940_p0 = pnand %p2938_p12, %p2894_p11  ;;  %p2946_p3 = scmp.lt.s32.totalorder %s2944_s24, %s2937_s27 }
  0x72   : > { %p2941_p2 = pneg %p2940_p0  ;;  %p2947_p10 = por %p2946_p3, %p2945_p13 }
  0x74   : > { %p2948_p9 = pnand %p2947_p10, %p2941_p2 }
  0x76   : > { %2951 = shalt.err (!%p2948_p9)
}
  0x77   : > { %2631 = dma.hbm_to_vmem [thread:$0]  (!%p3167_p8), %s3209_s14, 2048, %s3213_s12, %s3215_s18, %s3005_s9, %s3005_s9, %s3006_s19  }
  0x78   : > { %p3778_p11 = scmp.ne.s32.totalorder %s3774_s30, 0 }
  0x79   : > { %s306_s0 = sand.u32 (!%p3778_p11), 1, %s2990_s25   ;;  %p3779_p7 = scmp.ne.s32.totalorder (!%p3778_p11), %s3773_s29, 0 }
  0x7a   : > { %304 = sbr.rel (%p3778_p11) target bundleno = 811 (0x32b), region = 48  ;;  %s2159_s22 = sshll.u32 (!%p3778_p11), %s306_s0, 7 }
  0x7b   : > { %s307_s21 = scalar_lea.sflag (!%p3778_p11), [#allocation5], %s306_s0  ;;  %s3247_s13 = scalar_lea.vmem (!%p3778_p11), [#allocation4], %s2159_s22 }
  0x81   : > { %2969 = dma.done.wait (%p3779_p7), %s307_s21, 2048  }
  0x82   : > { %2971 = vsyncadd (%p3779_p7), %s307_s21, 4294965248  ;;  %s315_s16 = sand.u32 1, %s3068_s28   ;;  %s3254_s9 = scalar_lea.vmem [#allocation6], %s2159_s22 }
  0x83   : > { %s316_s15 = scalar_lea.sflag [#allocation7], %s315_s16 }
  0x84   : > { %2973 = dma.done.wait (%p3779_p7), %s316_s15, 2048  }
  0x85   : > { %2975 = vsyncadd (%p3779_p7), %s316_s15, 4294965248  ;;  %p3780_p8 = scmp.eq.s32.totalorder %s3068_s28, 0 }
  0x87   : > { %2977 = dma.done.wait (%p3780_p8), [#allocation7], 8192   ;;  %p3781_p1 = pmov %p3780_p8 }
  0x89   : > { %2979 = vsyncadd (%p3781_p1), [#allocation7], 4294959104  ;;  %p3782_p4 = pmov %p3781_p1 }
  0x8a   : > { %p3783_p5 = pmov %p3781_p1 }
  0x8b   : > { %2981 = dma.done.wait (%p3782_p4), [#allocation10], 8192  }
  0x8c   : > { %2983 = vsyncadd (%p3783_p5), [#allocation10], 4294959104  ;;  %s2163_s30 = sshll.u32 %s3068_s28, 4  ;;  %p3784_p12 = scmp.ne.s32.totalorder %s3068_s28, 0 }
  0x8d   : > { %p367_p6 = scmp.lt.s32.totalorder %s2163_s30, 63  ;;  %v2167_v0 = vld [vmem:[%s3763_s2] ss:$0 sm:$0xff] (!%p3784_p12) }
  0x8e   : > { %376 = sbr.rel (%p3784_p12) target bundleno = 158 (0x9e), region = 68  ;;  %v2168_v1 = vld [vmem:[%s3764_s3] ss:$0 sm:$0xff] (!%p3784_p12)  ;;  %384 = vst [vmem:[#allocation2] sm:$0xff] (!%p3784_p12), %v2167_v0  ;;  %385 = vst [vmem:[#allocation2 + $0x8] sm:$0xff] (!%p3784_p12), %v2167_v0 }
  0x8f   : > { %s3790_s30 = smov (!%p367_p6, %s2163_s30), 63  ;;  %386 = vst [vmem:[#allocation2 + $0x10] sm:$0xff] (!%p3784_p12), %v2167_v0  ;;  %387 = vst [vmem:[#allocation2 + $0x18] sm:$0xff] (!%p3784_p12), %v2167_v0 }
  0x90   : > { %s2173_s19 = sshll.u32 %s3790_s30, 4  ;;  %388 = vst [vmem:[#allocation2 + $0x20] sm:$0xff] (!%p3784_p12), %v2167_v0  ;;  %389 = vst [vmem:[#allocation2 + $0x28] sm:$0xff] (!%p3784_p12), %v2167_v0 }
  0x91   : > { %s3272_s12 = scalar_lea.vmem %s3768_s7, %s2173_s19  ;;  %390 = vst [vmem:[#allocation2 + $0x30] sm:$0xff] (!%p3784_p12), %v2167_v0  ;;  %391 = vst [vmem:[#allocation2 + $0x38] sm:$0xff] (!%p3784_p12), %v2167_v0 }
  0x92   : > { %392 = vst [vmem:[#allocation2 + $0x40] sm:$0xff] (!%p3784_p12), %v2167_v0  ;;  %393 = vst [vmem:[#allocation2 + $0x48] sm:$0xff] (!%p3784_p12), %v2167_v0 }
  0x93   : > { %394 = vst [vmem:[#allocation2 + $0x50] sm:$0xff] (!%p3784_p12), %v2167_v0  ;;  %395 = vst [vmem:[#allocation2 + $0x58] sm:$0xff] (!%p3784_p12), %v2167_v0 }
  0x94   : > { %396 = vst [vmem:[#allocation2 + $0x60] sm:$0xff] (!%p3784_p12), %v2167_v0  ;;  %397 = vst [vmem:[#allocation2 + $0x68] sm:$0xff] (!%p3784_p12), %v2167_v0 }
  0x95   : > { %398 = vst [vmem:[#allocation2 + $0x70] sm:$0xff] %v2167_v0  ;;  %399 = vst [vmem:[#allocation2 + $0x78] sm:$0xff] %v2167_v0 }
  0x96   : > { %407 = vst [vmem:[#allocation3] sm:$0xff] %v2168_v1  ;;  %408 = vst [vmem:[#allocation3 + $0x8] sm:$0xff] %v2168_v1 }
  0x97   : > { %409 = vst [vmem:[#allocation3 + $0x10] sm:$0xff] %v2168_v1  ;;  %410 = vst [vmem:[#allocation3 + $0x18] sm:$0xff] %v2168_v1 }
  0x98   : > { %411 = vst [vmem:[#allocation3 + $0x20] sm:$0xff] %v2168_v1  ;;  %412 = vst [vmem:[#allocation3 + $0x28] sm:$0xff] %v2168_v1 }
  0x99   : > { %413 = vst [vmem:[#allocation3 + $0x30] sm:$0xff] %v2168_v1  ;;  %414 = vst [vmem:[#allocation3 + $0x38] sm:$0xff] %v2168_v1 }
  0x9a   : > { %415 = vst [vmem:[#allocation3 + $0x40] sm:$0xff] %v2168_v1  ;;  %416 = vst [vmem:[#allocation3 + $0x48] sm:$0xff] %v2168_v1 }
  0x9b   : > { %417 = vst [vmem:[#allocation3 + $0x50] sm:$0xff] %v2168_v1  ;;  %418 = vst [vmem:[#allocation3 + $0x58] sm:$0xff] %v2168_v1 }
  0x9c   : > { %419 = vst [vmem:[#allocation3 + $0x60] sm:$0xff] %v2168_v1  ;;  %420 = vst [vmem:[#allocation3 + $0x68] sm:$0xff] %v2168_v1 }
  0x9d   : > { %421 = vst [vmem:[#allocation3 + $0x70] sm:$0xff] %v2168_v1  ;;  %422 = vst [vmem:[#allocation3 + $0x78] sm:$0xff] %v2168_v1 }
  0x9e PF: > { %v600_v2 = vld [vmem:[#allocation3] sm:$0xff]  ;;  %v601_v3 = vld [vmem:[#allocation3 + $0x8] sm:$0xff]  ;;  %v602_v4 = vld [vmem:[#allocation3 + $0x10] sm:$0xff] }
  0x9f   : > { %v2382_v5 = vpack.c.bf16 %v601_v3, %v600_v2  ;;  %v603_v6 = vld [vmem:[#allocation3 + $0x18] sm:$0xff]  ;;  %v604_v8 = vld [vmem:[#allocation3 + $0x20] sm:$0xff]  ;;  %v605_v9 = vld [vmem:[#allocation3 + $0x28] sm:$0xff] }
  0xa0   : > { %v2386_v7 = vpack.c.bf16 %v603_v6, %v602_v4  ;;  %v2390_v10 = vpack.c.bf16 %v605_v9, %v604_v8  ;;  %v423_v11 = vld [vmem:[%s3254_s9] sm:$0xff]  ;;  %v606_v12 = vld [vmem:[#allocation3 + $0x30] sm:$0xff]  ;;  %v607_v13 = vld [vmem:[#allocation3 + $0x38] sm:$0xff] }
  0xa1   : > { %2383 = vmatprep.subr.bf16.mxu1 %v2382_v5  ;;  %2326 = vmatprep.mubr.f32.mxu1 %v423_v11  ;;  %v2394_v14 = vpack.c.bf16 %v607_v13, %v606_v12  ;;  %v608_v15 = vld [vmem:[#allocation3 + $0x40] sm:$0xff]  ;;  %v609_v16 = vld [vmem:[#allocation3 + $0x48] sm:$0xff]  ;;  %v441_v19 = vld [vmem:[#allocation2 + $0x10] sm:$0xff] }
  0xa2   : > { %2385 = vmatpush3.bf16.msra.mxu1 %v2382_v5  ;;  %2270 = vmatprep.mubr.f32.mxu0 %v423_v11  ;;  %v439_v17 = vld [vmem:[#allocation2] sm:$0xff]  ;;  %v440_v18 = vld [vmem:[#allocation2 + $0x8] sm:$0xff]  ;;  %v442_v20 = vld [vmem:[#allocation2 + $0x18] sm:$0xff]  ;;  %v2398_v23 = vpack.c.bf16 %v609_v16, %v608_v15 }
  0xa3   : > { %2387 = vmatprep.subr.bf16.mxu1 %v2386_v7  ;;  %v2350_v21 = vpack.c.bf16 %v440_v18, %v439_v17  ;;  %v2354_v22 = vpack.c.bf16 %v442_v20, %v441_v19  ;;  %v443_v24 = vld [vmem:[#allocation2 + $0x20] sm:$0xff]  ;;  %v444_v25 = vld [vmem:[#allocation2 + $0x28] sm:$0xff]  ;;  %v610_v26 = vld [vmem:[#allocation3 + $0x50] sm:$0xff] }
  0xa4   : > { %v611_v27 = vld [vmem:[#allocation3 + $0x58] sm:$0xff]  ;;  %v2358_v28 = vpack.c.bf16 %v444_v25, %v443_v24  ;;  %v445_v30 = vld [vmem:[#allocation2 + $0x30] sm:$0xff]  ;;  %v612_v32 = vld [vmem:[#allocation3 + $0x60] sm:$0xff] }
  0xa5   : > { %2351 = vmatprep.subr.bf16.mxu0 %v2350_v21  ;;  %v2402_v29 = vpack.c.bf16 %v611_v27, %v610_v26  ;;  %v446_v31 = vld [vmem:[#allocation2 + $0x38] sm:$0xff]  ;;  %v613_v33 = vld [vmem:[#allocation3 + $0x68] sm:$0xff]  ;;  %v447_v36 = vld [vmem:[#allocation2 + $0x40] sm:$0xff] }
  0xa6   : > { %2389 = vmatpush3.bf16.msra.mxu1 %v2386_v7  ;;  %2353 = vmatpush3.bf16.msra.mxu0 %v2350_v21  ;;  %v2362_v34 = vpack.c.bf16 %v446_v31, %v445_v30  ;;  %v2406_v35 = vpack.c.bf16 %v613_v33, %v612_v32  ;;  %v448_v37 = vld [vmem:[#allocation2 + $0x48] sm:$0xff]  ;;  %v614_v38 = vld [vmem:[#allocation3 + $0x70] sm:$0xff]  ;;  %v615_v39 = vld [vmem:[#allocation3 + $0x78] sm:$0xff] }
  0xa7   : > { %2391 = vmatprep.subr.bf16.mxu1 %v2390_v10  ;;  %2355 = vmatprep.subr.bf16.mxu0 %v2354_v22  ;;  %v2366_v40 = vpack.c.bf16 %v448_v37, %v447_v36  ;;  %v2410_v41 = vpack.c.bf16 %v615_v39, %v614_v38  ;;  %v449_v42 = vld [vmem:[#allocation2 + $0x50] sm:$0xff]  ;;  %v450_v43 = vld [vmem:[#allocation2 + $0x58] sm:$0xff]  ;;  %v451_v47 = vld [vmem:[#allocation2 + $0x60] sm:$0xff] }
  0xa8   : > { %v844_v44 = vld [vmem:[#allocation9 + $0x18] sm:$0xff]  ;;  %v2370_v46 = vpack.c.bf16 %v450_v43, %v449_v42  ;;  %v452_v48 = vld [vmem:[#allocation2 + $0x68] sm:$0xff]  ;;  %v843_v50 = vld [vmem:[#allocation9 + $0x10] sm:$0xff] }
  0xa9   : > { %v848_v45 = vld [vmem:[#allocation9 + $0x38] sm:$0xff]  ;;  %v847_v51 = vld [vmem:[#allocation9 + $0x30] sm:$0xff]  ;;  %v424_v54 = vld [vmem:[%s3254_s9 + $0x8] sm:$0xff]  ;;  %v2374_v55 = vpack.c.bf16 %v452_v48, %v451_v47 }
  0xaa   : > { %2393 = vmatpush3.bf16.msra.mxu1 %v2390_v10  ;;  %2357 = vmatpush3.bf16.msra.mxu0 %v2354_v22  ;;  %v2446_v49 = vpack.c.bf16 %v848_v45, %v844_v44  ;;  %v852_v52 = vld [vmem:[#allocation9 + $0x58] sm:$0xff]  ;;  %v3285_v56 = vld [vmem:[%s3254_s9 + $0x10] sm:$0xff]  ;;  %v2448_v59 = vpack.c.bf16 %v847_v51, %v843_v50  ;;  %v3292_v3 = vld [vmem:[%s3254_s9 + $0x20] sm:$0xff] }
  0xab   : > { %2395 = vmatprep.subr.bf16.mxu1 %v2394_v14  ;;  %2359 = vmatprep.subr.bf16.mxu0 %v2358_v28  ;;  %v856_v53 = vld [vmem:[#allocation9 + $0x78] sm:$0xff]  ;;  %v453_v57 = vld [vmem:[#allocation2 + $0x70] sm:$0xff]  ;;  %v842_v4 = vld [vmem:[#allocation9 + $0x8] sm:$0xff] }
  0xac   : > { %v454_v58 = vld [vmem:[#allocation2 + $0x78] sm:$0xff]  ;;  %v2450_v60 = vpack.c.bf16 %v856_v53, %v852_v52  ;;  %v851_v61 = vld [vmem:[#allocation9 + $0x50] sm:$0xff]  ;;  %v846_v5 = vld [vmem:[#allocation9 + $0x28] sm:$0xff] }
  0xad   : > { %v855_v62 = vld [vmem:[#allocation9 + $0x70] sm:$0xff]  ;;  %v860_v63 = vld [vmem:[#allocation9 + $0x98] sm:$0xff]  ;;  %v2378_v2 = vpack.c.bf16 %v454_v58, %v453_v57  ;;  %v3297_v12 = vld [vmem:[%s3254_s9 + $0x28] sm:$0xff]  ;;  %v2414_v13 = vpack.c.bf16 %v846_v5, %v842_v4 }
  0xae   : > { %2397 = vmatpush3.bf16.msra.mxu1 %v2394_v14  ;;  %2361 = vmatpush3.bf16.msra.mxu0 %v2358_v28  ;;  %v864_v0 = vld [vmem:[#allocation9 + $0xb8] sm:$0xff]  ;;  %v2452_v6 = vpack.c.bf16 %v855_v62, %v851_v61  ;;  %v859_v8 = vld [vmem:[#allocation9 + $0x90] sm:$0xff]  ;;  %v841_v14 = vld [vmem:[#allocation9] sm:$0xff] }
  0xaf   : > { %2399 = vmatprep.subr.bf16.mxu1 %v2398_v23  ;;  %2363 = vmatprep.subr.bf16.mxu0 %v2362_v34  ;;  %v3289_v1 = vld [vmem:[%s3254_s9 + $0x18] sm:$0xff]  ;;  %v2454_v7 = vpack.c.bf16 %v864_v0, %v860_v63  ;;  %v863_v9 = vld [vmem:[#allocation9 + $0xb0] sm:$0xff]  ;;  %v845_v15 = vld [vmem:[#allocation9 + $0x20] sm:$0xff] }
  0xb0   : > { %v868_v10 = vld [vmem:[#allocation9 + $0xd8] sm:$0xff]  ;;  %v3300_v16 = vld [vmem:[%s3254_s9 + $0x30] sm:$0xff]  ;;  %v850_v17 = vld [vmem:[#allocation9 + $0x48] sm:$0xff]  ;;  %v2456_v18 = vpack.c.bf16 %v863_v9, %v859_v8 }
  0xb1   : > { %v872_v11 = vld [vmem:[#allocation9 + $0xf8] sm:$0xff]  ;;  %v854_v19 = vld [vmem:[#allocation9 + $0x68] sm:$0xff]  ;;  %v867_v21 = vld [vmem:[#allocation9 + $0xd0] sm:$0xff] }
  0xb2   : > { %2401 = vmatpush3.bf16.msra.mxu1 %v2398_v23  ;;  %2365 = vmatpush3.bf16.msra.mxu0 %v2362_v34  ;;  %v2458_v20 = vpack.c.bf16 %v872_v11, %v868_v10  ;;  %v871_v22 = vld [vmem:[#allocation9 + $0xf0] sm:$0xff]  ;;  %v2416_v23 = vpack.c.bf16 %v845_v15, %v841_v14  ;;  %v876_v24 = vld [vmem:[#allocation9 + $0x118] sm:$0xff]  ;;  %v849_v27 = vld [vmem:[#allocation9 + $0x40] sm:$0xff]  ;;  %v2418_v30 = vpack.c.bf16 %v854_v19, %v850_v17 }
  0xb3   : > { %2403 = vmatprep.subr.bf16.mxu1 %v2402_v29  ;;  %2367 = vmatprep.subr.bf16.mxu0 %v2366_v40  ;;  %v880_v25 = vld [vmem:[#allocation9 + $0x138] sm:$0xff]  ;;  %v853_v28 = vld [vmem:[#allocation9 + $0x60] sm:$0xff]  ;;  %v858_v31 = vld [vmem:[#allocation9 + $0x88] sm:$0xff]  ;;  %v2460_v32 = vpack.c.bf16 %v871_v22, %v867_v21 }
  0xb4   : > { %v3305_v26 = vld [vmem:[%s3254_s9 + $0x38] sm:$0xff]  ;;  %v862_v33 = vld [vmem:[#allocation9 + $0xa8] sm:$0xff]  ;;  %v2462_v34 = vpack.c.bf16 %v880_v25, %v876_v24  ;;  %v879_v36 = vld [vmem:[#allocation9 + $0x130] sm:$0xff]  ;;  %v2420_v37 = vpack.c.bf16 %v853_v28, %v849_v27 }
  0xb5   : > { %v884_v38 = vld [vmem:[#allocation9 + $0x158] sm:$0xff]  ;;  %v861_v42 = vld [vmem:[#allocation9 + $0xa0] sm:$0xff]  ;;  %v3317_v43 = vld [vmem:[%s3254_s9 + $0x50] sm:$0xff]  ;;  %v2422_v44 = vpack.c.bf16 %v862_v33, %v858_v31 }
  0xb6   : > { %2405 = vmatpush3.bf16.msra.mxu1 %v2402_v29  ;;  %2369 = vmatpush3.bf16.msra.mxu0 %v2366_v40  ;;  %v3308_v29 = vld [vmem:[%s3254_s9 + $0x40] sm:$0xff]  ;;  %v888_v39 = vld [vmem:[#allocation9 + $0x178] sm:$0xff]  ;;  %v3313_v40 = vld [vmem:[%s3254_s9 + $0x48] sm:$0xff] }
  0xb7   : > { %2407 = vmatprep.subr.bf16.mxu1 %v2406_v35  ;;  %2371 = vmatprep.subr.bf16.mxu0 %v2370_v46  ;;  %v866_v45 = vld [vmem:[#allocation9 + $0xc8] sm:$0xff]  ;;  %v2466_v48 = vpack.c.bf16 %v888_v39, %v884_v38  ;;  %v887_v50 = vld [vmem:[#allocation9 + $0x170] sm:$0xff]  ;;  %v892_v52 = vld [vmem:[#allocation9 + $0x198] sm:$0xff] }
  0xb8   : > { %v870_v47 = vld [vmem:[#allocation9 + $0xe8] sm:$0xff]  ;;  %v896_v53 = vld [vmem:[#allocation9 + $0x1b8] sm:$0xff]  ;;  %v435_v57 = vld [vmem:[%s3254_s9 + $0x60] sm:$0xff] }
  0xb9   : > { %v2426_v58 = vpack.c.bf16 %v870_v47, %v866_v45  ;;  %v878_v61 = vld [vmem:[#allocation9 + $0x128] sm:$0xff]  ;;  %v2470_v62 = vpack.c.bf16 %v896_v53, %v892_v52  ;;  %v891_v63 = vld [vmem:[#allocation9 + $0x190] sm:$0xff]  ;;  %v873_v5 = vld [vmem:[#allocation9 + $0x100] sm:$0xff] }
  0xba   : > { %2409 = vmatpush3.bf16.msra.mxu1 %v2406_v35  ;;  %2373 = vmatpush3.bf16.msra.mxu0 %v2370_v46  ;;  %v875_v35 = vld [vmem:[#allocation9 + $0x110] sm:$0xff]  ;;  %v436_v4 = vld [vmem:[%s3254_s9 + $0x68] sm:$0xff]  ;;  %v885_v19 = vld [vmem:[#allocation9 + $0x160] sm:$0xff] }
  0xbb   : > { %2411 = vmatprep.subr.bf16.mxu1 %v2410_v41  ;;  %2375 = vmatprep.subr.bf16.mxu0 %v2374_v55  ;;  %v2464_v46 = vpack.c.bf16 %v879_v36, %v875_v35  ;;  %v895_v0 = vld [vmem:[#allocation9 + $0x1b0] sm:$0xff]  ;;  %v882_v9 = vld [vmem:[#allocation9 + $0x148] sm:$0xff]  ;;  %v889_v25 = vld [vmem:[#allocation9 + $0x180] sm:$0xff] }
  0xbc   : > { %v886_v10 = vld [vmem:[#allocation9 + $0x168] sm:$0xff]  ;;  %v2472_v11 = vpack.c.bf16 %v895_v0, %v891_v63  ;;  %v903_v14 = vld [vmem:[#allocation9 + $0x1f0] sm:$0xff]  ;;  %v897_v31 = vld [vmem:[#allocation9 + $0x1c0] sm:$0xff] }
  0xbd   : > { %v2434_v17 = vpack.c.bf16 %v886_v10, %v882_v9  ;;  %v894_v21 = vld [vmem:[#allocation9 + $0x1a8] sm:$0xff]  ;;  %v784_v39 = vld [vmem:[#allocation8 + $0x38] sm:$0xff]  ;;  %v785_v52 = vld [vmem:[#allocation8 + $0x40] sm:$0xff] }
  0xbe   : > { %2413 = vmatpush3.bf16.msra.mxu1 %v2410_v41  ;;  %2377 = vmatpush3.bf16.msra.mxu0 %v2374_v55  ;;  %v857_v41 = vld [vmem:[#allocation9 + $0x80] sm:$0xff]  ;;  %v898_v27 = vld [vmem:[#allocation9 + $0x1c8] sm:$0xff]  ;;  %v788_v47 = vld [vmem:[#allocation8 + $0x58] sm:$0xff] }
  0xbf   : > { %2447 = vmatprep.subr.bf16.mxu1 %v2446_v49  ;;  %2379 = vmatprep.subr.bf16.mxu0 %v2378_v2  ;;  %v883_v49 = vld [vmem:[#allocation9 + $0x150] sm:$0xff]  ;;  %v2424_v51 = vpack.c.bf16 %v861_v42, %v857_v41  ;;  %v865_v55 = vld [vmem:[#allocation9 + $0xc0] sm:$0xff]  ;;  %v902_v28 = vld [vmem:[#allocation9 + $0x1e8] sm:$0xff] }
  0xc0   : > { %v778_v35 = vld [vmem:[#allocation8 + $0x8] sm:$0xff]  ;;  %v777_v41 = vld [vmem:[#allocation8] sm:$0xff] }
  0xc1   : > { %2327 = vmatmul.mubr.f32.vlgmr.msra.gmra.mrb[0].mxu1 %v424_v54  ;;  %v782_v36 = vld [vmem:[#allocation8 + $0x28] sm:$0xff]  ;;  %v781_v42 = vld [vmem:[#allocation8 + $0x20] sm:$0xff] }
  0xc2   : > { %2329 = vmatprep.mubr.f32.mxu1 %v3285_v56  ;;  %2449 = vmatpush1.bf16.msra.mxu1 %v2448_v59  ;;  %v874_v59 = vld [vmem:[#allocation9 + $0x108] sm:$0xff]  ;;  %v2478_v38 = vpack.c.bf16 %v782_v36, %v778_v35  ;;  %v789_v53 = vld [vmem:[#allocation8 + $0x60] sm:$0xff] }
  0xc3   : > { %2451 = vmatprep.subr.bf16.mxu1 %v2450_v60  ;;  %2381 = vmatpush3.bf16.msra.mxu0 %v2378_v2  ;;  %v2468_v60 = vpack.c.bf16 %v887_v50, %v883_v49  ;;  %v900_v2 = vld [vmem:[#allocation9 + $0x1d8] sm:$0xff]  ;;  %v2430_v8 = vpack.c.bf16 %v878_v61, %v874_v59  ;;  %v786_v45 = vld [vmem:[#allocation8 + $0x48] sm:$0xff]  ;;  %v2480_v49 = vpack.c.bf16 %v781_v42, %v777_v41 }
  0xc4   : > { %2415 = vmatprep.subr.bf16.mxu0 %v2414_v13  ;;  %v899_v13 = vld [vmem:[#allocation9 + $0x1d0] sm:$0xff]  ;;  %v794_v59 = vld [vmem:[#allocation8 + $0x88] sm:$0xff]  ;;  %v796_v61 = vld [vmem:[#allocation8 + $0x98] sm:$0xff]  ;;  %v2484_v0 = vpack.c.bf16 %v789_v53, %v785_v52 }
  0xc5   : > { %2330 = vmatmul.mubr.f32.gmra.mrb[2].mxu1 %v3289_v1  ;;  %v2476_v22 = vpack.c.bf16 %v903_v14, %v899_v13  ;;  %v802_v9 = vld [vmem:[#allocation8 + $0xc8] sm:$0xff]  ;;  %v820_v42 = vld [vmem:[#allocation8 + $0x158] sm:$0xff] }
  0xc6   : > { %2332 = vmatprep.mubr.f32.mxu1 %v3292_v3  ;;  %2453 = vmatpush1.bf16.msra.mxu1 %v2452_v6  ;;  %v877_v6 = vld [vmem:[#allocation9 + $0x120] sm:$0xff]  ;;  %v806_v10 = vld [vmem:[#allocation8 + $0xe8] sm:$0xff] }
  0xc7   : > { %2455 = vmatprep.subr.bf16.mxu1 %v2454_v7  ;;  %2271 = vmatmul.mubr.f32.vlgmr.msra.gmra.mrb[0].mxu0 %v424_v54  ;;  %v3323_v54 = vld [vmem:[%s3254_s9 + $0x58] sm:$0xff]  ;;  %v437_v7 = vld [vmem:[%s3254_s9 + $0x70] sm:$0xff]  ;;  %v2432_v15 = vpack.c.bf16 %v877_v6, %v873_v5  ;;  %v822_v41 = vld [vmem:[#allocation8 + $0x168] sm:$0xff] }
  0xc8   : > { %2417 = vmatpush1.bf16.msra.mxu0 %v2416_v23  ;;  %2273 = vmatprep.mubr.f32.mxu0 %v3285_v56  ;;  %v869_v56 = vld [vmem:[#allocation9 + $0xe0] sm:$0xff] }
  0xc9   : > { %2333 = vmatmul.mubr.f32.gmra.mrb[4].mxu1 %v3297_v12  ;;  %2419 = vmatprep.subr.bf16.mxu0 %v2418_v30  ;;  %v2442_v30 = vpack.c.bf16 %v902_v28, %v898_v27 }
  0xca   : > { %2335 = vmatprep.mubr.f32.mxu1 %v3300_v16  ;;  %2457 = vmatpush1.bf16.msra.mxu1 %v2456_v18  ;;  %v881_v18 = vld [vmem:[#allocation9 + $0x140] sm:$0xff] }
  0xcb   : > { %2459 = vmatprep.subr.bf16.mxu1 %v2458_v20  ;;  %2274 = vmatmul.mubr.f32.gmra.mrb[2].mxu0 %v3289_v1  ;;  %v2428_v1 = vpack.c.bf16 %v869_v56, %v865_v55  ;;  %v890_v20 = vld [vmem:[#allocation9 + $0x188] sm:$0xff]  ;;  %v2436_v23 = vpack.c.bf16 %v885_v19, %v881_v18  ;;  %v2490_v19 = vpack.c.bf16 %v806_v10, %v802_v9  ;;  %v836_v10 = vld [vmem:[#allocation8 + $0x1d8] sm:$0xff] }
  0xcc   : > { %2421 = vmatpush1.bf16.msra.mxu0 %v2420_v37  ;;  %2276 = vmatprep.mubr.f32.mxu0 %v3292_v3  ;;  %v904_v3 = vld [vmem:[#allocation9 + $0x1f8] sm:$0xff]  ;;  %v2438_v24 = vpack.c.bf16 %v894_v21, %v890_v20  ;;  %v803_v21 = vld [vmem:[#allocation8 + $0xd0] sm:$0xff]  ;;  %v838_v9 = vld [vmem:[#allocation8 + $0x1e8] sm:$0xff] }
  0xcd   : > { %2336 = vmatmul.mubr.f32.gmra.mrb[6].mxu1 %v3305_v26  ;;  %2423 = vmatprep.subr.bf16.mxu0 %v2422_v44  ;;  %v780_v37 = vld [vmem:[#allocation8 + $0x18] sm:$0xff]  ;;  %v783_v44 = vld [vmem:[#allocation8 + $0x30] sm:$0xff] }
  0xce   : > { %2338 = vmatprep.mubr.f32.mxu1 %v3308_v29  ;;  %2461 = vmatpush1.bf16.msra.mxu1 %v2460_v32  ;;  %v901_v32 = vld [vmem:[#allocation9 + $0x1e0] sm:$0xff] }
  0xcf   : > { %2463 = vmatprep.subr.bf16.mxu1 %v2462_v34  ;;  %2277 = vmatmul.mubr.f32.gmra.mrb[4].mxu0 %v3297_v12  ;;  %v2474_v12 = vpack.c.bf16 %v904_v3, %v900_v2  ;;  %v2444_v33 = vpack.c.bf16 %v901_v32, %v897_v31  ;;  %v3008_v34 = vmov 0.0   ;;  %v793_v2 = vld [vmem:[#allocation8 + $0x80] sm:$0xff] }
  0xd0   : > { %2425 = vmatpush1.bf16.msra.mxu0 %v2424_v51  ;;  %2279 = vmatprep.mubr.f32.mxu0 %v3300_v16  ;;  %v438_v16 = vld [vmem:[%s3254_s9 + $0x78] sm:$0xff]  ;;  %v797_v3 = vld [vmem:[#allocation8 + $0xa0] sm:$0xff] }
  0xd1   : > { %2339 = vmatmul.mubr.f32.gmra.mrb[8].mxu1 %v3313_v40  ;;  %2427 = vmatprep.subr.bf16.mxu0 %v2426_v58  ;;  %v791_v58 = vld [vmem:[#allocation8 + $0x70] sm:$0xff]  ;;  %v2488_v14 = vpack.c.bf16 %v797_v3, %v793_v2  ;;  %v809_v31 = vld [vmem:[#allocation8 + $0x100] sm:$0xff] }
  0xd2   : > { %2341 = vmatprep.mubr.f32.mxu1 %v3317_v43  ;;  %2465 = vmatpush1.bf16.msra.mxu1 %v2464_v46  ;;  %v790_v46 = vld [vmem:[#allocation8 + $0x68] sm:$0xff]  ;;  %v813_v32 = vld [vmem:[#allocation8 + $0x120] sm:$0xff] }
  0xd3   : > { %2467 = vmatprep.subr.bf16.mxu1 %v2466_v48  ;;  %2280 = vmatmul.mubr.f32.gmra.mrb[6].mxu0 %v3305_v26  ;;  %v893_v26 = vld [vmem:[#allocation9 + $0x1a0] sm:$0xff]  ;;  %v792_v48 = vld [vmem:[#allocation8 + $0x78] sm:$0xff]  ;;  %v2482_v55 = vpack.c.bf16 %v790_v46, %v786_v45  ;;  %v2496_v46 = vpack.c.bf16 %v813_v32, %v809_v31 }
  0xd4   : > { %2429 = vmatpush1.bf16.msra.mxu0 %v2428_v1  ;;  %2282 = vmatprep.mubr.f32.mxu0 %v3308_v29  ;;  %v2440_v29 = vpack.c.bf16 %v893_v26, %v889_v25  ;;  %v2514_v56 = vpack.c.bf16 %v792_v48, %v788_v47  ;;  %v812_v25 = vld [vmem:[#allocation8 + $0x118] sm:$0xff]  ;;  %v817_v48 = vld [vmem:[#allocation8 + $0x140] sm:$0xff] }
  0xd5   : > { %2342 = vmatmul.mubr.f32.gmra.mrb[10].mxu1 %v3323_v54  ;;  %2431 = vmatprep.subr.bf16.mxu0 %v2430_v8  ;;  %v799_v8 = vld [vmem:[#allocation8 + $0xb0] sm:$0xff]  ;;  %v816_v26 = vld [vmem:[#allocation8 + $0x138] sm:$0xff] }
  0xd6   : > { %2344 = vmatprep.mubr.f32.mxu1 %v435_v57  ;;  %2469 = vmatpush1.bf16.msra.mxu1 %v2468_v60  ;;  %v798_v60 = vld [vmem:[#allocation8 + $0xa8] sm:$0xff] }
  0xd7   : > { %2471 = vmatprep.subr.bf16.mxu1 %v2470_v62  ;;  %2283 = vmatmul.mubr.f32.gmra.mrb[8].mxu0 %v3313_v40  ;;  %v2510_v40 = vpack.c.bf16 %v784_v39, %v780_v37  ;;  %v800_v62 = vld [vmem:[#allocation8 + $0xb8] sm:$0xff]  ;;  %v2486_v5 = vpack.c.bf16 %v798_v60, %v794_v59  ;;  %v2526_v37 = vpack.c.bf16 %v816_v26, %v812_v25  ;;  %v815_v39 = vld [vmem:[#allocation8 + $0x130] sm:$0xff] }
  0xd8   : > { %2433 = vmatpush1.bf16.msra.mxu0 %v2432_v15  ;;  %2285 = vmatprep.mubr.f32.mxu0 %v3317_v43  ;;  %v779_v43 = vld [vmem:[#allocation8 + $0x10] sm:$0xff]  ;;  %v2518_v6 = vpack.c.bf16 %v800_v62, %v796_v61  ;;  %v832_v59 = vld [vmem:[#allocation8 + $0x1b8] sm:$0xff] }
  0xd9   : > { %2345 = vmatmul.mubr.f32.gmra.mrb[12].mxu1 %v436_v4  ;;  %2435 = vmatprep.subr.bf16.mxu0 %v2434_v17  ;;  %v2512_v50 = vpack.c.bf16 %v783_v44, %v779_v43  ;;  %v805_v17 = vld [vmem:[#allocation8 + $0xe0] sm:$0xff]  ;;  %v824_v43 = vld [vmem:[#allocation8 + $0x178] sm:$0xff] }
  0xda   : > { %2347 = vmatprep.mubr.f32.mxu1 %v437_v7  ;;  %2473 = vmatpush1.bf16.msra.mxu1 %v2472_v11  ;;  %v804_v11 = vld [vmem:[#allocation8 + $0xd8] sm:$0xff]  ;;  %v2530_v53 = vpack.c.bf16 %v824_v43, %v820_v42  ;;  %v765_v43 = vld [vmem:[%s3247_s13 + $0x20] sm:$0xff] }
  0xdb   : > { %2475 = vmatprep.subr.bf16.mxu1 %v2474_v12  ;;  %2286 = vmatmul.mubr.f32.gmra.mrb[10].mxu0 %v3323_v54  ;;  %v808_v12 = vld [vmem:[#allocation8 + $0xf8] sm:$0xff] }
  0xdc   : > { %2437 = vmatpush1.bf16.msra.mxu0 %v2436_v23  ;;  %2288 = vmatprep.mubr.f32.mxu0 %v435_v57  ;;  %v787_v57 = vld [vmem:[#allocation8 + $0x50] sm:$0xff]  ;;  %v2522_v20 = vpack.c.bf16 %v808_v12, %v804_v11  ;;  %v810_v23 = vld [vmem:[#allocation8 + $0x108] sm:$0xff]  ;;  %v840_v11 = vld [vmem:[#allocation8 + $0x1f8] sm:$0xff] }
  0xdd   : > { %2348 = vmatmul.mubr.f32.gmra.mrb[14].mxu1 %v438_v16  ;;  %2439 = vmatprep.subr.bf16.mxu0 %v2438_v24  ;;  %v2516_v1 = vpack.c.bf16 %v791_v58, %v787_v57  ;;  %v814_v24 = vld [vmem:[#allocation8 + $0x128] sm:$0xff]  ;;  %v828_v58 = vld [vmem:[#allocation8 + $0x198] sm:$0xff] }
  0xde   : > { %2477 = vmatpush1.bf16.msra.mxu1 %v2476_v22  ;;  %1130 = vmatprep.mubr.f32.mxu1 %v3008_v34  ;;  %v807_v22 = vld [vmem:[#allocation8 + $0xf0] sm:$0xff]  ;;  %v2494_v36 = vpack.c.bf16 %v814_v24, %v810_v23  ;;  %v830_v57 = vld [vmem:[#allocation8 + $0x1a8] sm:$0xff]  ;;  %v764_v42 = vld [vmem:[%s3247_s13 + $0x18] sm:$0xff] }
  0xdf   : > { %2289 = vmatmul.mubr.f32.gmra.mrb[12].mxu0 %v436_v4  ;;  %2511 = vmatprep.subr.bf16.mxu1 %v2510_v40  ;;  %v818_v40 = vld [vmem:[#allocation8 + $0x148] sm:$0xff]  ;;  %v839_v23 = vld [vmem:[#allocation8 + $0x1f0] sm:$0xff] }
  0xe0   : > { %2441 = vmatpush1.bf16.msra.mxu0 %v2440_v29  ;;  %2291 = vmatprep.mubr.f32.mxu0 %v437_v7  ;;  %v795_v7 = vld [vmem:[#allocation8 + $0x90] sm:$0xff]  ;;  %v2498_v52 = vpack.c.bf16 %v822_v41, %v818_v40  ;;  %v762_v40 = vld [vmem:[%s3247_s13 + $0x8] sm:$0xff] }
  0xe1   : > { %2443 = vmatprep.subr.bf16.mxu0 %v2442_v30  ;;  %v2520_v15 = vpack.c.bf16 %v799_v8, %v795_v7  ;;  %v2524_v30 = vpack.c.bf16 %v807_v22, %v803_v21  ;;  %v831_v7 = vld [vmem:[#allocation8 + $0x1b0] sm:$0xff]  ;;  %v834_v8 = vld [vmem:[#allocation8 + $0x1c8] sm:$0xff]  ;;  %v837_v21 = vld [vmem:[#allocation8 + $0x1e0] sm:$0xff] }
  0xe2   : > { %v835_v22 = vld [vmem:[#allocation8 + $0x1d0] sm:$0xff] }
  0xe3   : > { %2292 = vmatmul.mubr.f32.gmra.mrb[14].mxu0 %v438_v16  ;;  %v801_v16 = vld [vmem:[#allocation8 + $0xc0] sm:$0xff]  ;;  %v763_v41 = vld [vmem:[%s3247_s13 + $0x10] sm:$0xff] }
  0xe4   : > { %2445 = vmatpush1.bf16.msra.mxu0 %v2444_v33  ;;  %969 = vmatprep.mubr.f32.mxu0 %v3008_v34  ;;  %v2492_v29 = vpack.c.bf16 %v805_v17, %v801_v16  ;;  %v833_v17 = vld [vmem:[#allocation8 + $0x1c0] sm:$0xff] }
  0xe5   : > { %2479 = vmatprep.subr.bf16.mxu0 %v2478_v38  ;;  %v811_v38 = vld [vmem:[#allocation8 + $0x110] sm:$0xff]  ;;  %v2508_v26 = vpack.c.bf16 %v837_v21, %v833_v17 }
  0xe6   : > { %v2528_v47 = vpack.c.bf16 %v815_v39, %v811_v38  ;;  %v761_v39 = vld [vmem:[%s3247_s13] sm:$0xff] }
 0x194   : > { %v2328_v51 = vpop.f32.mrb[0].mxu1 }
 0x195   : > { %v682_v54 = vpop.f32.mrb[1].mxu1 }
 0x196   : > { %970 = vmatmul.mubr.f32.vlgmr.msra.gmra.mrb[16].mxu0 %v682_v54  ;;  %1131 = vmatmul.mubr.f32.vlgmr.msra.gmra.mrb[16].mxu1 %v682_v54  ;;  %v819_v54 = vld [vmem:[#allocation8 + $0x150] sm:$0xff] }
 0x197   : > { %2481 = vmatpush1.bf16.msra.mxu0 %v2480_v49  ;;  %2513 = vmatpush1.bf16.msra.mxu1 %v2512_v50  ;;  %v821_v49 = vld [vmem:[#allocation8 + $0x160] sm:$0xff] }
 0x198   : > { %975 = vmatprep.mubr.f32.mxu0 %v3008_v34  ;;  %1136 = vmatprep.mubr.f32.mxu1 %v3008_v34  ;;  %v2331_v63 = vpop.f32.mrb[2].mxu1  ;;  %v2500_v62 = vpack.c.bf16 %v821_v49, %v817_v48  ;;  %v769_v48 = vld [vmem:[%s3247_s13 + $0x40] sm:$0xff]  ;;  %v770_v49 = vld [vmem:[%s3247_s13 + $0x48] sm:$0xff] }
 0x199   : > { %v692_v4 = vpop.f32.mrb[3].mxu1  ;;  %2483 = vmatprep.subr.bf16.mxu0 %v2482_v55  ;;  %2515 = vmatprep.subr.bf16.mxu1 %v2514_v56  ;;  %v823_v55 = vld [vmem:[#allocation8 + $0x170] sm:$0xff]  ;;  %v826_v56 = vld [vmem:[#allocation8 + $0x188] sm:$0xff] }
 0x19a   : > { %976 = vmatmul.mubr.f32.gmra.mrb[18].mxu0 %v2328_v51  ;;  %1137 = vmatmul.mubr.f32.gmra.mrb[18].mxu1 %v2328_v51  ;;  %v3348_v27 = vpop.f32.mrb[0].mxu0 }
 0x19b   : > { %981 = vmatprep.mubr.f32.mxu0 %v3008_v34  ;;  %1142 = vmatprep.mubr.f32.mxu1 %v3008_v34  ;;  %v3352_v33 = vpop.f32.mrb[1].mxu0 }
 0x19c   : > { %2485 = vmatpush1.bf16.msra.mxu0 %v2484_v0  ;;  %2517 = vmatpush1.bf16.msra.mxu1 %v2516_v1  ;;  %v3344_v13 = vpop.f32.mrb[4].mxu1  ;;  %v825_v0 = vld [vmem:[#allocation8 + $0x180] sm:$0xff] }
 0x19d   : > { %v702_v18 = vpop.f32.mrb[5].mxu1  ;;  %2487 = vmatprep.subr.bf16.mxu0 %v2486_v5  ;;  %2519 = vmatprep.subr.bf16.mxu1 %v2518_v6  ;;  %v829_v1 = vld [vmem:[#allocation8 + $0x1a0] sm:$0xff]  ;;  %v2534_v5 = vpack.c.bf16 %v832_v59, %v828_v58  ;;  %v827_v6 = vld [vmem:[#allocation8 + $0x190] sm:$0xff] }
 0x19e   : > { %982 = vmatmul.mubr.f32.gmra.mrb[20].mxu0 %v692_v4  ;;  %1143 = vmatmul.mubr.f32.gmra.mrb[20].mxu1 %v692_v4  ;;  %v3358_v44 = vpop.f32.mrb[2].mxu0  ;;  %v2502_v4 = vpack.c.bf16 %v830_v57, %v826_v56  ;;  %v2536_v16 = vpack.c.bf16 %v831_v7, %v827_v6  ;;  %v776_v56 = vld [vmem:[%s3247_s13 + $0x78] sm:$0xff]  ;;  %v1551_v57 = vlaneseq }
 0x19f   : > { %987 = vmatprep.mubr.f32.mxu0 %v3008_v34  ;;  %1148 = vmatprep.mubr.f32.mxu1 %v3008_v34  ;;  %v3362_v50 = vpop.f32.mrb[3].mxu0 }
 0x1a0   : > { %2489 = vmatpush1.bf16.msra.mxu0 %v2488_v14  ;;  %2521 = vmatpush1.bf16.msra.mxu1 %v2520_v15  ;;  %v3350_v28 = vpop.f32.mrb[6].mxu1  ;;  %v2504_v15 = vpack.c.bf16 %v829_v1, %v825_v0  ;;  %v1552_v58 = vshrl.u32 %v1551_v57, 7 }
 0x1a1   : > { %v3354_v35 = vpop.f32.mrb[7].mxu1  ;;  %2491 = vmatprep.subr.bf16.mxu0 %v2490_v19  ;;  %2523 = vmatprep.subr.bf16.mxu1 %v2522_v20  ;;  %v2538_v20 = vpack.c.bf16 %v840_v11, %v836_v10 }
 0x1a2   : > { %988 = vmatmul.mubr.f32.gmra.mrb[22].mxu0 %v2331_v63  ;;  %1149 = vmatmul.mubr.f32.gmra.mrb[22].mxu1 %v2331_v63  ;;  %v3368_v60 = vpop.f32.mrb[4].mxu0  ;;  %v2532_v63 = vpack.c.bf16 %v823_v55, %v819_v54  ;;  %v774_v54 = vld [vmem:[%s3247_s13 + $0x68] sm:$0xff]  ;;  %v775_v55 = vld [vmem:[%s3247_s13 + $0x70] sm:$0xff]  ;;  %v1553_v59 = vsub.s32 0, %v1552_v58  ;;  %v1565_v0 = vsub.s32 3, %v1552_v58 }
 0x1a3   : > { %993 = vmatprep.mubr.f32.mxu0 %v3008_v34  ;;  %1154 = vmatprep.mubr.f32.mxu1 %v3008_v34  ;;  %v3372_v2 = vpop.f32.mrb[5].mxu0 }
 0x1a4   : > { %2493 = vmatpush1.bf16.msra.mxu0 %v2492_v29  ;;  %2525 = vmatpush1.bf16.msra.mxu1 %v2524_v30  ;;  %v3360_v45 = vpop.f32.mrb[8].mxu1  ;;  %v2540_v29 = vpack.c.bf16 %v839_v23, %v835_v22 }
 0x1a5   : > { %v3364_v51 = vpop.f32.mrb[9].mxu1  ;;  %2495 = vmatprep.subr.bf16.mxu0 %v2494_v36  ;;  %2527 = vmatprep.subr.bf16.mxu1 %v2526_v37 }
 0x1a6   : > { %994 = vmatmul.mubr.f32.gmra.mrb[24].mxu0 %v702_v18  ;;  %1155 = vmatmul.mubr.f32.gmra.mrb[24].mxu1 %v702_v18  ;;  %v3380_v12 = vpop.f32.mrb[6].mxu0 }
 0x1a7   : > { %999 = vmatprep.mubr.f32.mxu0 %v3008_v34  ;;  %1160 = vmatprep.mubr.f32.mxu1 %v3008_v34  ;;  %v3382_v18 = vpop.f32.mrb[7].mxu0 }
 0x1a8   : > { %2497 = vmatpush1.bf16.msra.mxu0 %v2496_v46  ;;  %2529 = vmatpush1.bf16.msra.mxu1 %v2528_v47  ;;  %v3370_v61 = vpop.f32.mrb[10].mxu1  ;;  %v767_v46 = vld [vmem:[%s3247_s13 + $0x30] sm:$0xff]  ;;  %v768_v47 = vld [vmem:[%s3247_s13 + $0x38] sm:$0xff] }
 0x1a9   : > { %v3374_v3 = vpop.f32.mrb[11].mxu1  ;;  %2499 = vmatprep.subr.bf16.mxu0 %v2498_v52  ;;  %2531 = vmatprep.subr.bf16.mxu1 %v2530_v53  ;;  %v772_v52 = vld [vmem:[%s3247_s13 + $0x58] sm:$0xff]  ;;  %v773_v53 = vld [vmem:[%s3247_s13 + $0x60] sm:$0xff] }
 0x1aa   : > { %1000 = vmatmul.mubr.f32.gmra.mrb[26].mxu0 %v3344_v13  ;;  %1161 = vmatmul.mubr.f32.gmra.mrb[26].mxu1 %v3344_v13  ;;  %v2506_v13 = vpack.c.bf16 %v838_v9, %v834_v8  ;;  %v3388_v24 = vpop.f32.mrb[8].mxu0 }
 0x1ab   : > { %1005 = vmatprep.mubr.f32.mxu0 %v3008_v34  ;;  %1166 = vmatprep.mubr.f32.mxu1 %v3008_v34  ;;  %v3390_v30 = vpop.f32.mrb[9].mxu0 }
 0x1ac   : > { %2501 = vmatpush1.bf16.msra.mxu0 %v2500_v62  ;;  %2533 = vmatpush1.bf16.msra.mxu1 %v2532_v63  ;;  %v2346_v14 = vpop.f32.mrb[12].mxu1  ;;  %v1549_v62 = vld [vmem:[%s3767_s6] sm:$0xf]  ;;  %v1557_v63 = vsub.s32 1, %v1552_v58 }
 0x1ad   : > { %v742_v19 = vpop.f32.mrb[13].mxu1  ;;  %2503 = vmatprep.subr.bf16.mxu0 %v2502_v4  ;;  %2535 = vmatprep.subr.bf16.mxu1 %v2534_v5  ;;  %v3481_v1 = vrot.slane %v1549_v62, %v1553_v59 }
 0x1ae   : > { %1006 = vmatmul.mubr.f32.gmra.mrb[28].mxu0 %v3354_v35  ;;  %1167 = vmatmul.mubr.f32.gmra.mrb[28].mxu1 %v3354_v35  ;;  %v3396_v32 = vpop.f32.mrb[10].mxu0  ;;  %v3485_v4 = vrot.slane %v1549_v62, %v1557_v63 }
 0x1af   : > { %1011 = vmatprep.mubr.f32.mxu0 %v3008_v34  ;;  %1172 = vmatprep.mubr.f32.mxu1 %v3008_v34  ;;  %v3398_v35 = vpop.f32.mrb[11].mxu0 }
 0x1b0   : > { %2505 = vmatpush1.bf16.msra.mxu0 %v2504_v15  ;;  %2537 = vmatpush1.bf16.msra.mxu1 %v2536_v16  ;;  %v2349_v25 = vpop.f32.mrb[14].mxu1 }
 0x1b1   : > { %v752_v31 = vpop.f32.mrb[15].mxu1  ;;  %2507 = vmatprep.subr.bf16.mxu0 %v2506_v13  ;;  %2539 = vmatprep.subr.bf16.mxu1 %v2538_v20 }
 0x1b2   : > { %1012 = vmatmul.mubr.f32.gmra.mrb[30].mxu0 %v3350_v28  ;;  %1173 = vmatmul.mubr.f32.gmra.mrb[30].mxu1 %v3350_v28  ;;  %v3404_v36 = vpop.f32.mrb[12].mxu0 }
 0x1b3   : > { %1017 = vmatprep.mubr.f32.mxu0 %v3008_v34  ;;  %1178 = vmatprep.mubr.f32.mxu1 %v3008_v34  ;;  %v3406_v28 = vpop.f32.mrb[13].mxu0 }
 0x1b4   : > { %2509 = vmatpush1.bf16.msra.mxu0 %v2508_v26  ;;  %2541 = vmatpush1.bf16.msra.mxu1 %v2540_v29 }
 0x1b6   : > { %1018 = vmatmul.mubr.f32.gmra.mrb[32].mxu0 %v3364_v51  ;;  %1179 = vmatmul.mubr.f32.gmra.mrb[32].mxu1 %v3364_v51  ;;  %v3412_v37 = vpop.f32.mrb[14].mxu0  ;;  %v771_v51 = vld [vmem:[%s3247_s13 + $0x50] sm:$0xff] }
 0x1b7   : > { %1023 = vmatprep.mubr.f32.mxu0 %v3008_v34  ;;  %1184 = vmatprep.mubr.f32.mxu1 %v3008_v34  ;;  %v3414_v38 = vpop.f32.mrb[15].mxu0 }
 0x1ba   : > { %1024 = vmatmul.mubr.f32.gmra.mrb[34].mxu0 %v3360_v45  ;;  %1185 = vmatmul.mubr.f32.gmra.mrb[34].mxu1 %v3360_v45  ;;  %v766_v45 = vld [vmem:[%s3247_s13 + $0x28] sm:$0xff] }
 0x1bb   : > { %1029 = vmatprep.mubr.f32.mxu0 %v3008_v34  ;;  %1190 = vmatprep.mubr.f32.mxu1 %v3008_v34 }
 0x1be   : > { %1030 = vmatmul.mubr.f32.gmra.mrb[36].mxu0 %v3374_v3  ;;  %1191 = vmatmul.mubr.f32.gmra.mrb[36].mxu1 %v3374_v3 }
 0x1bf   : > { %1035 = vmatprep.mubr.f32.mxu0 %v3008_v34  ;;  %1196 = vmatprep.mubr.f32.mxu1 %v3008_v34 }
 0x1c2   : > { %1036 = vmatmul.mubr.f32.gmra.mrb[38].mxu0 %v3370_v61  ;;  %1197 = vmatmul.mubr.f32.gmra.mrb[38].mxu1 %v3370_v61  ;;  %v1561_v61 = vsub.s32 2, %v1552_v58 }
 0x1c3   : > { %1041 = vmatprep.mubr.f32.mxu0 %v3008_v34  ;;  %1202 = vmatprep.mubr.f32.mxu1 %v3008_v34 }
 0x1c4   : > { %v3483_v3 = vrot.slane %v1549_v62, %v1561_v61 }
 0x1c6   : > { %1042 = vmatmul.mubr.f32.gmra.mrb[40].mxu0 %v742_v19  ;;  %1203 = vmatmul.mubr.f32.gmra.mrb[40].mxu1 %v742_v19 }
 0x1c7   : > { %1047 = vmatprep.mubr.f32.mxu0 %v3008_v34  ;;  %1208 = vmatprep.mubr.f32.mxu1 %v3008_v34 }
 0x1ca   : > { %1048 = vmatmul.mubr.f32.gmra.mrb[42].mxu0 %v2346_v14  ;;  %1209 = vmatmul.mubr.f32.gmra.mrb[42].mxu1 %v2346_v14 }
 0x1cb   : > { %1053 = vmatprep.mubr.f32.mxu0 %v3008_v34  ;;  %1214 = vmatprep.mubr.f32.mxu1 %v3008_v34 }
 0x1ce   : > { %1054 = vmatmul.mubr.f32.gmra.mrb[44].mxu0 %v752_v31  ;;  %1215 = vmatmul.mubr.f32.gmra.mrb[44].mxu1 %v752_v31 }
 0x1cf   : > { %1059 = vmatprep.mubr.f32.mxu0 %v3008_v34  ;;  %1220 = vmatprep.mubr.f32.mxu1 %v3008_v34 }
 0x1d2   : > { %1060 = vmatmul.mubr.f32.gmra.mrb[46].mxu0 %v2349_v25  ;;  %1221 = vmatmul.mubr.f32.gmra.mrb[46].mxu1 %v2349_v25 }
 0x1d3   : > { %1291 = vmatprep.mubr.f32.mxu0 %v3008_v34  ;;  %1452 = vmatprep.mubr.f32.mxu1 %v3008_v34 }
 0x1d6   : > { %1292 = vmatmul.mubr.f32.vlgmr.msra.gmra.mrb[16].mxu0 %v761_v39  ;;  %1453 = vmatmul.mubr.f32.vlgmr.msra.gmra.mrb[16].mxu1 %v761_v39 }
 0x1d7   : > { %1297 = vmatprep.mubr.f32.mxu0 %v3008_v34  ;;  %1458 = vmatprep.mubr.f32.mxu1 %v3008_v34 }
 0x1da   : > { %1298 = vmatmul.mubr.f32.gmra.mrb[18].mxu0 %v762_v40  ;;  %1459 = vmatmul.mubr.f32.gmra.mrb[18].mxu1 %v762_v40 }
 0x1db   : > { %1303 = vmatprep.mubr.f32.mxu0 %v3008_v34  ;;  %1464 = vmatprep.mubr.f32.mxu1 %v3008_v34 }
 0x1de   : > { %1304 = vmatmul.mubr.f32.gmra.mrb[20].mxu0 %v763_v41  ;;  %1465 = vmatmul.mubr.f32.gmra.mrb[20].mxu1 %v763_v41 }
 0x1df   : > { %1309 = vmatprep.mubr.f32.mxu0 %v3008_v34  ;;  %1470 = vmatprep.mubr.f32.mxu1 %v3008_v34 }
 0x1e2   : > { %1310 = vmatmul.mubr.f32.gmra.mrb[22].mxu0 %v764_v42  ;;  %1471 = vmatmul.mubr.f32.gmra.mrb[22].mxu1 %v764_v42 }
 0x1e3   : > { %1315 = vmatprep.mubr.f32.mxu0 %v3008_v34  ;;  %1476 = vmatprep.mubr.f32.mxu1 %v3008_v34 }
 0x1e6   : > { %1316 = vmatmul.mubr.f32.gmra.mrb[24].mxu0 %v765_v43  ;;  %1477 = vmatmul.mubr.f32.gmra.mrb[24].mxu1 %v765_v43 }
 0x1e7   : > { %1321 = vmatprep.mubr.f32.mxu0 %v3008_v34  ;;  %1482 = vmatprep.mubr.f32.mxu1 %v3008_v34 }
 0x1ea   : > { %1322 = vmatmul.mubr.f32.gmra.mrb[26].mxu0 %v766_v45  ;;  %1483 = vmatmul.mubr.f32.gmra.mrb[26].mxu1 %v766_v45 }
 0x1eb   : > { %1327 = vmatprep.mubr.f32.mxu0 %v3008_v34  ;;  %1488 = vmatprep.mubr.f32.mxu1 %v3008_v34 }
 0x1ee   : > { %1328 = vmatmul.mubr.f32.gmra.mrb[28].mxu0 %v767_v46  ;;  %1489 = vmatmul.mubr.f32.gmra.mrb[28].mxu1 %v767_v46 }
 0x1ef   : > { %1333 = vmatprep.mubr.f32.mxu0 %v3008_v34  ;;  %1494 = vmatprep.mubr.f32.mxu1 %v3008_v34 }
 0x1f2   : > { %1334 = vmatmul.mubr.f32.gmra.mrb[30].mxu0 %v768_v47  ;;  %1495 = vmatmul.mubr.f32.gmra.mrb[30].mxu1 %v768_v47 }
 0x1f3   : > { %1339 = vmatprep.mubr.f32.mxu0 %v3008_v34  ;;  %1500 = vmatprep.mubr.f32.mxu1 %v3008_v34 }
 0x1f6   : > { %1340 = vmatmul.mubr.f32.gmra.mrb[32].mxu0 %v769_v48  ;;  %1501 = vmatmul.mubr.f32.gmra.mrb[32].mxu1 %v769_v48 }
 0x1f7   : > { %1345 = vmatprep.mubr.f32.mxu0 %v3008_v34  ;;  %1506 = vmatprep.mubr.f32.mxu1 %v3008_v34 }
 0x1fa   : > { %1346 = vmatmul.mubr.f32.gmra.mrb[34].mxu0 %v770_v49  ;;  %1507 = vmatmul.mubr.f32.gmra.mrb[34].mxu1 %v770_v49 }
 0x1fb   : > { %1351 = vmatprep.mubr.f32.mxu0 %v3008_v34  ;;  %1512 = vmatprep.mubr.f32.mxu1 %v3008_v34 }
 0x1fe   : > { %1352 = vmatmul.mubr.f32.gmra.mrb[36].mxu0 %v771_v51  ;;  %1513 = vmatmul.mubr.f32.gmra.mrb[36].mxu1 %v771_v51 }
 0x1ff   : > { %1357 = vmatprep.mubr.f32.mxu0 %v3008_v34  ;;  %1518 = vmatprep.mubr.f32.mxu1 %v3008_v34 }
 0x202   : > { %1358 = vmatmul.mubr.f32.gmra.mrb[38].mxu0 %v772_v52  ;;  %1519 = vmatmul.mubr.f32.gmra.mrb[38].mxu1 %v772_v52 }
 0x203   : > { %1363 = vmatprep.mubr.f32.mxu0 %v3008_v34  ;;  %1524 = vmatprep.mubr.f32.mxu1 %v3008_v34 }
 0x206   : > { %1364 = vmatmul.mubr.f32.gmra.mrb[40].mxu0 %v773_v53  ;;  %1525 = vmatmul.mubr.f32.gmra.mrb[40].mxu1 %v773_v53 }
 0x207   : > { %1369 = vmatprep.mubr.f32.mxu0 %v3008_v34  ;;  %1530 = vmatprep.mubr.f32.mxu1 %v3008_v34 }
 0x20a   : > { %1370 = vmatmul.mubr.f32.gmra.mrb[42].mxu0 %v774_v54  ;;  %1531 = vmatmul.mubr.f32.gmra.mrb[42].mxu1 %v774_v54 }
 0x20b   : > { %1375 = vmatprep.mubr.f32.mxu0 %v3008_v34  ;;  %1536 = vmatprep.mubr.f32.mxu1 %v3008_v34 }
 0x20e   : > { %1376 = vmatmul.mubr.f32.gmra.mrb[44].mxu0 %v775_v55  ;;  %1537 = vmatmul.mubr.f32.gmra.mrb[44].mxu1 %v775_v55 }
 0x20f   : > { %1381 = vmatprep.mubr.f32.mxu0 %v3008_v34  ;;  %1542 = vmatprep.mubr.f32.mxu1 %v3008_v34  ;;  %v3487_v34 = vrot.slane %v1549_v62, %v1565_v0 }
 0x212   : > { %1382 = vmatmul.mubr.f32.gmra.mrb[46].mxu0 %v776_v56  ;;  %1543 = vmatmul.mubr.f32.gmra.mrb[46].mxu1 %v776_v56 }
 0x2a9   : > { %v1293_v5 = vpop.f32.mrb[16].mxu0  ;;  %v1454_v6 = vpop.f32.mrb[16].mxu1 }
 0x2aa   : > { %v1571_v7 = vadd.f32 %v3481_v1, %v1293_v5  ;;  %v1573_v8 = vadd.f32 %v3483_v3, %v1454_v6  ;;  %v1295_v9 = vpop.f32.mrb[17].mxu0  ;;  %v1456_v10 = vpop.f32.mrb[17].mxu1 }
 0x2ab   : > { %v1572_v11 = vadd.f32 %v3485_v4, %v1295_v9  ;;  %v1574_v14 = vadd.f32 %v3487_v34, %v1456_v10 }
 0x2ac   : > { %v1635_v15 = vmul.f32 0.5, %v1571_v7  ;;  %v1637_v16 = vmul.f32 0.5, %v1573_v8 }
 0x2ad   : > { %v1636_v17 = vmul.f32 0.5, %v1572_v11  ;;  %v1638_v19 = vmul.f32 0.5, %v1574_v14  ;;  %v1299_v13 = vpop.f32.mrb[18].mxu0  ;;  %v1460_v20 = vpop.f32.mrb[18].mxu1 }
 0x2ae   : > { %2676 = vtanh.f32 %v1635_v15  ;;  %v1575_v21 = vadd.f32 %v3481_v1, %v1299_v13  ;;  %v1577_v22 = vadd.f32 %v3483_v3, %v1460_v20  ;;  %v1301_v23 = vpop.f32.mrb[19].mxu0  ;;  %v1462_v25 = vpop.f32.mrb[19].mxu1 }
 0x2af   : > { %2678 = vtanh.f32 %v1637_v16  ;;  %v1576_v26 = vadd.f32 %v3485_v4, %v1301_v23  ;;  %v1578_v29 = vadd.f32 %v3487_v34, %v1462_v25 }
 0x2b0   : > { %2680 = vtanh.f32 %v1636_v17  ;;  %v1639_v31 = vmul.f32 0.5, %v1575_v21  ;;  %v1641_v39 = vmul.f32 0.5, %v1577_v22 }
 0x2b1   : > { %2682 = vtanh.f32 %v1638_v19  ;;  %v1640_v40 = vmul.f32 0.5, %v1576_v26  ;;  %v1642_v41 = vmul.f32 0.5, %v1578_v29  ;;  %v1305_v42 = vpop.f32.mrb[20].mxu0  ;;  %v1466_v43 = vpop.f32.mrb[20].mxu1 }
 0x2b2   : > { %2684 = vtanh.f32 %v1639_v31  ;;  %v1579_v45 = vadd.f32 %v3481_v1, %v1305_v42  ;;  %v1581_v46 = vadd.f32 %v3483_v3, %v1466_v43  ;;  %v1307_v47 = vpop.f32.mrb[21].mxu0  ;;  %v1468_v48 = vpop.f32.mrb[21].mxu1 }
 0x2b3   : > { %2686 = vtanh.f32 %v1641_v39  ;;  %v1580_v49 = vadd.f32 %v3485_v4, %v1307_v47  ;;  %v1582_v51 = vadd.f32 %v3487_v34, %v1468_v48 }
 0x2b4   : > { %2688 = vtanh.f32 %v1640_v40  ;;  %v1643_v52 = vmul.f32 0.5, %v1579_v45  ;;  %v1645_v53 = vmul.f32 0.5, %v1581_v46 }
 0x2b5   : > { %2690 = vtanh.f32 %v1642_v41  ;;  %v1644_v54 = vmul.f32 0.5, %v1580_v49  ;;  %v1646_v55 = vmul.f32 0.5, %v1582_v51  ;;  %v1311_v56 = vpop.f32.mrb[22].mxu0  ;;  %v1472_v57 = vpop.f32.mrb[22].mxu1 }
 0x2b6   : > { %2692 = vtanh.f32 %v1643_v52  ;;  %v1583_v58 = vadd.f32 %v3481_v1, %v1311_v56  ;;  %v1585_v59 = vadd.f32 %v3483_v3, %v1472_v57  ;;  %v1313_v61 = vpop.f32.mrb[23].mxu0  ;;  %v1474_v62 = vpop.f32.mrb[23].mxu1 }
 0x2b7   : > { %2694 = vtanh.f32 %v1645_v53  ;;  %v1584_v63 = vadd.f32 %v3485_v4, %v1313_v61  ;;  %v1586_v0 = vadd.f32 %v3487_v34, %v1474_v62 }
 0x2b8   : > { %v2677_v5 = vpop.eup %2676  ;;  %2696 = vtanh.f32 %v1644_v54  ;;  %v1647_v6 = vmul.f32 0.5, %v1583_v58  ;;  %v1649_v7 = vmul.f32 0.5, %v1585_v59 }
 0x2b9   : > { %v2679_v8 = vpop.eup %2678  ;;  %v1763_v9 = vmul.f32 0.5, %v2677_v5  ;;  %2698 = vtanh.f32 %v1646_v55  ;;  %v1648_v10 = vmul.f32 0.5, %v1584_v63  ;;  %v1650_v11 = vmul.f32 0.5, %v1586_v0  ;;  %v1317_v14 = vpop.f32.mrb[24].mxu0 }
 0x2ba   : > { %v1478_v15 = vpop.f32.mrb[24].mxu1  ;;  %v2681_v16 = vpop.eup %2680  ;;  %2700 = vtanh.f32 %v1647_v6  ;;  %v1587_v17 = vadd.f32 %v3481_v1, %v1317_v14  ;;  %v1765_v21 = vmul.f32 0.5, %v2679_v8 }
 0x2bb   : > { %v1319_v19 = vpop.f32.mrb[25].mxu0  ;;  %v1480_v13 = vpop.f32.mrb[25].mxu1  ;;  %v1764_v22 = vmul.f32 0.5, %v2681_v16  ;;  %2702 = vtanh.f32 %v1649_v7  ;;  %v1827_v26 = vadd.f32 0.5, %v1763_v9  ;;  %v1589_v47 = vadd.f32 %v3483_v3, %v1478_v15 }
 0x2bc   : > { %v2683_v20 = vpop.eup %2682  ;;  %v1588_v23 = vadd.f32 %v3485_v4, %v1319_v19  ;;  %2704 = vtanh.f32 %v1648_v10  ;;  %v1651_v31 = vmul.f32 0.5, %v1587_v17  ;;  %v3512_v53 = vadd.f32 0.5, %v1765_v21 }
 0x2bd   : > { %v2685_v25 = vpop.eup %2684  ;;  %v1766_v29 = vmul.f32 0.5, %v2683_v20  ;;  %v1828_v40 = vadd.f32 0.5, %v1764_v22  ;;  %2706 = vtanh.f32 %v1650_v11  ;;  %v1323_v42 = vpop.f32.mrb[26].mxu0  ;;  %v1590_v0 = vadd.f32 %v3487_v34, %v1480_v13 }
 0x2be   : > { %v2687_v39 = vpop.eup %2686  ;;  %v1767_v41 = vmul.f32 0.5, %v2685_v25  ;;  %v1484_v43 = vpop.f32.mrb[26].mxu1  ;;  %2708 = vtanh.f32 %v1651_v31  ;;  %v1652_v48 = vmul.f32 0.5, %v1588_v23  ;;  %v1591_v5 = vadd.f32 %v3481_v1, %v1323_v42 }
 0x2bf   : > { %v2689_v45 = vpop.eup %2688  ;;  %v1830_v46 = vadd.f32 0.5, %v1766_v29  ;;  %v3508_v49 = vpop.f32.mrb[27].mxu0  ;;  %v1907_v54 = vmul.f32 %v1828_v40, %v3352_v33  ;;  %v1769_v9 = vmul.f32 0.5, %v2687_v39  ;;  %v1653_v11 = vmul.f32 0.5, %v1589_v47 }
 0x2c0   : > { %v3510_v51 = vpop.f32.mrb[27].mxu1  ;;  %v2691_v52 = vpop.eup %2690  ;;  %v1768_v55 = vmul.f32 0.5, %v2689_v45  ;;  %v1831_v58 = vadd.f32 0.5, %v1767_v41  ;;  %2710 = vtanh.f32 %v1652_v48  ;;  %v1654_v13 = vmul.f32 0.5, %v1590_v0 }
 0x2c1   : > { %v2693_v56 = vpop.eup %2692  ;;  %v1891_v57 = vmul.f32 %v1830_v46, %v1827_v26  ;;  %v1770_v59 = vmul.f32 0.5, %v2691_v52  ;;  %v3517_v6 = vpop.f32.mrb[28].mxu0  ;;  %v1593_v20 = vadd.f32 %v3483_v3, %v1484_v43  ;;  %v1655_v39 = vmul.f32 0.5, %v1591_v5 }
 0x2c2   : > { %v2695_v61 = vpop.eup %2694  ;;  %v1832_v62 = vadd.f32 0.5, %v1768_v55  ;;  %v1771_v63 = vmul.f32 0.5, %v2693_v56  ;;  %v3519_v7 = vpop.f32.mrb[28].mxu1  ;;  %v3532_v42 = vadd.f32 0.5, %v1769_v9  ;;  %v1592_v5 = vadd.f32 %v3485_v4, %v3508_v49 }
 0x2c3   : > { %v2697_v8 = vpop.eup %2696  ;;  %v1923_v33 = vadd.f32 %v1907_v54, %v1891_v57  ;;  %v1834_v10 = vadd.f32 0.5, %v1770_v59  ;;  %v3521_v14 = vpop.f32.mrb[29].mxu0  ;;  %v1657_v55 = vmul.f32 0.5, %v1593_v20 }
 0x2c4   : > { %v3523_v15 = vpop.f32.mrb[29].mxu1  ;;  %v2699_v16 = vpop.eup %2698  ;;  %v1908_v17 = vmul.f32 %v3348_v27, %v1832_v62  ;;  %v1772_v19 = vmul.f32 0.5, %v2697_v8  ;;  %v1835_v23 = vadd.f32 0.5, %v1771_v63  ;;  %v3540_v62 = vmul.f32 0.5, %v2695_v61 }
 0x2c5   : > { %v2701_v21 = vpop.eup %2700  ;;  %2712 = vtanh.f32 %v1923_v33  ;;  %1971 = vst [vmem:[#allocation2] sm:$0xff] %v1923_v33  ;;  %2003 = vst [vmem:[%s3272_s12] sm:$0xff] %v1923_v33  ;;  %v1892_v22 = vmul.f32 %v1834_v10, %v1831_v58  ;;  %v1774_v25 = vmul.f32 0.5, %v2699_v16  ;;  %v3528_v40 = vpop.f32.mrb[30].mxu0  ;;  %v1594_v16 = vadd.f32 %v3487_v34, %v3510_v51 }
 0x2c6   : > { %v2703_v26 = vpop.eup %2702  ;;  %v1836_v29 = vadd.f32 0.5, %v1772_v19  ;;  %v1775_v31 = vmul.f32 0.5, %v2701_v21  ;;  %2714 = vtanh.f32 %v1654_v13  ;;  %v3530_v41 = vpop.f32.mrb[30].mxu1  ;;  %v1656_v49 = vmul.f32 0.5, %v1592_v5 }
 0x2c7   : > { %v2705_v27 = vpop.eup %2704  ;;  %v1924_v43 = vadd.f32 %v1908_v17, %v1892_v22  ;;  %v1838_v45 = vadd.f32 0.5, %v1774_v25  ;;  %2716 = vtanh.f32 %v1653_v11  ;;  %v3534_v46 = vpop.f32.mrb[31].mxu0  ;;  %v1777_v10 = vmul.f32 0.5, %v2703_v26 }
 0x2c8   : > { %v3536_v47 = vpop.f32.mrb[31].mxu1  ;;  %v2707_v48 = vpop.eup %2706  ;;  %v1909_v52 = vmul.f32 %v1836_v29, %v3362_v50  ;;  %v1776_v54 = vmul.f32 0.5, %v2705_v27  ;;  %2718 = vtanh.f32 %v1655_v39  ;;  %v1839_v58 = vadd.f32 0.5, %v1775_v31 }
 0x2c9   : > { %v2709_v56 = vpop.eup %2708  ;;  %2720 = vtanh.f32 %v1924_v43  ;;  %1972 = vst [vmem:[#allocation2 + $0x8] sm:$0xff] %v1924_v43  ;;  %2004 = vst [vmem:[%s3272_s12 + $0x10] sm:$0xff] %v1924_v43  ;;  %v1893_v57 = vmul.f32 %v1838_v45, %v1835_v23  ;;  %v1778_v59 = vmul.f32 0.5, %v2707_v48  ;;  %v3544_v8 = vpop.f32.mrb[32].mxu0  ;;  %v1658_v22 = vmul.f32 0.5, %v1594_v16 }
 0x2ca   : > { %v1840_v63 = vadd.f32 0.5, %v1776_v54  ;;  %v1779_v0 = vmul.f32 0.5, %v2709_v56  ;;  %v3546_v50 = vpop.f32.mrb[32].mxu1  ;;  %v2711_v33 = vpop.eup %2710  ;;  %2722 = vtanh.f32 %v1657_v55  ;;  %v1595_v51 = vadd.f32 %v3481_v1, %v3517_v6 }
 0x2cb   : > { %v1925_v9 = vadd.f32 %v1909_v52, %v1893_v57  ;;  %v1842_v11 = vadd.f32 0.5, %v1778_v59  ;;  %v3550_v17 = vpop.f32.mrb[33].mxu0  ;;  %v3552_v61 = vpop.f32.mrb[33].mxu1  ;;  %v1780_v13 = vmul.f32 0.5, %v2711_v33  ;;  %v1597_v25 = vadd.f32 %v3483_v3, %v3519_v7 }
 0x2cc   : > { %v1910_v19 = vmul.f32 %v3358_v44, %v1840_v63  ;;  %v1843_v21 = vadd.f32 0.5, %v1779_v0  ;;  %v1596_v39 = vadd.f32 %v3485_v4, %v3521_v14  ;;  %v1598_v27 = vadd.f32 %v3487_v34, %v3523_v15 }
 0x2cd   : > { %2724 = vtanh.f32 %v1925_v9  ;;  %1973 = vst [vmem:[#allocation2 + $0x10] sm:$0xff] %v1925_v9  ;;  %2005 = vst [vmem:[%s3272_s12 + $0x20] sm:$0xff] %v1925_v9  ;;  %v1894_v20 = vmul.f32 %v1842_v11, %v1839_v58  ;;  %v1844_v23 = vadd.f32 0.5, %v1780_v13  ;;  %v3560_v26 = vpop.f32.mrb[34].mxu0  ;;  %v3562_v44 = vpop.f32.mrb[34].mxu1  ;;  %v1659_v52 = vmul.f32 0.5, %v1595_v51 }
 0x2ce   : > { %2726 = vtanh.f32 %v1656_v49  ;;  %v3568_v43 = vpop.f32.mrb[35].mxu0  ;;  %v3570_v6 = vpop.f32.mrb[35].mxu1  ;;  %v1661_v54 = vmul.f32 0.5, %v1597_v25  ;;  %v1660_v56 = vmul.f32 0.5, %v1596_v39  ;;  %v1662_v15 = vmul.f32 0.5, %v1598_v27 }
 0x2cf   : > { %v2713_v29 = vpop.eup %2712  ;;  %v1926_v31 = vadd.f32 %v1910_v19, %v1894_v20  ;;  %2728 = vtanh.f32 %v1658_v22  ;;  %v1911_v48 = vmul.f32 %v1844_v23, %v3372_v2  ;;  %v1599_v58 = vadd.f32 %v3481_v1, %v3528_v40 }
 0x2d0   : > { %v2715_v7 = vpop.eup %2714  ;;  %v1955_v45 = vmul.f32 %v2713_v29, %v3512_v53  ;;  %v1601_v2 = vadd.f32 %v3483_v3, %v3530_v41  ;;  %v1600_v53 = vadd.f32 %v3485_v4, %v3534_v46  ;;  %v1602_v9 = vadd.f32 %v3487_v34, %v3536_v47 }
 0x2d1   : > { %v3574_v55 = vpop.eup %2716  ;;  %2730 = vtanh.f32 %v1926_v31  ;;  %1974 = vst [vmem:[#allocation2 + $0x18] sm:$0xff] %v1926_v31  ;;  %2006 = vst [vmem:[%s3272_s12 + $0x30] sm:$0xff] %v1926_v31  ;;  %v1782_v14 = vmul.f32 0.5, %v2715_v7  ;;  %v3584_v59 = vpop.f32.mrb[36].mxu0  ;;  %v1663_v46 = vmul.f32 0.5, %v1599_v58  ;;  %v1837_v19 = vadd.f32 0.5, %v3540_v62 }
 0x2d2   : > { %v2719_v57 = vpop.eup %2718  ;;  %1987 = vst [vmem:[#allocation3] sm:$0xff] %v1955_v45  ;;  %2019 = vst [vmem:[%s3272_s12 + $0x8] sm:$0xff] %v1955_v45  ;;  %2732 = vtanh.f32 %v1659_v52  ;;  %v3586_v63 = vpop.f32.mrb[36].mxu1  ;;  %v1665_v16 = vmul.f32 0.5, %v1601_v2  ;;  %v1841_v13 = vadd.f32 0.5, %v1777_v10  ;;  %v1664_v47 = vmul.f32 0.5, %v1600_v53 }
 0x2d3   : > { %v2721_v0 = vpop.eup %2720  ;;  %v1846_v5 = vadd.f32 0.5, %v1782_v14  ;;  %v1783_v33 = vmul.f32 0.5, %v2719_v57  ;;  %2734 = vtanh.f32 %v1661_v54  ;;  %v3590_v11 = vpop.f32.mrb[37].mxu0  ;;  %v1666_v22 = vmul.f32 0.5, %v1602_v9 }
 0x2d4   : > { %v3592_v40 = vpop.f32.mrb[37].mxu1  ;;  %v1956_v41 = vmul.f32 %v2721_v0, %v3532_v42  ;;  %2736 = vtanh.f32 %v1660_v56  ;;  %v3596_v20 = vpop.eup %2722  ;;  %v1603_v23 = vadd.f32 %v3481_v1, %v3544_v8  ;;  %v1604_v7 = vadd.f32 %v3485_v4, %v3550_v17 }
 0x2d5   : > { %v1895_v49 = vmul.f32 %v1846_v5, %v1843_v21  ;;  %2738 = vtanh.f32 %v1662_v15  ;;  %v3601_v51 = vpop.f32.mrb[38].mxu0  ;;  %v3603_v42 = vpop.f32.mrb[38].mxu1  ;;  %v1847_v10 = vadd.f32 0.5, %v1783_v33  ;;  %v1605_v21 = vadd.f32 %v3483_v3, %v3546_v50 }
 0x2d6   : > { %1988 = vst [vmem:[#allocation3 + $0x8] sm:$0xff] %v1956_v41  ;;  %2020 = vst [vmem:[%s3272_s12 + $0x18] sm:$0xff] %v1956_v41  ;;  %2740 = vtanh.f32 %v1663_v46  ;;  %v3607_v29 = vpop.f32.mrb[39].mxu0  ;;  %v3609_v31 = vpop.f32.mrb[39].mxu1  ;;  %v1667_v8 = vmul.f32 0.5, %v1603_v23  ;;  %v1606_v50 = vadd.f32 %v3487_v34, %v3552_v61  ;;  %v1668_v14 = vmul.f32 0.5, %v1604_v7 }
 0x2d7   : > { %v2725_v25 = vpop.eup %2724  ;;  %v1927_v62 = vadd.f32 %v1911_v48, %v1895_v49  ;;  %2742 = vtanh.f32 %v1665_v16  ;;  %v1669_v52 = vmul.f32 0.5, %v1605_v21  ;;  %v1607_v56 = vadd.f32 %v3481_v1, %v3560_v26 }
 0x2d8   : > { %v2727_v39 = vpop.eup %2726  ;;  %v1957_v27 = vmul.f32 %v2725_v25, %v1837_v19  ;;  %2744 = vtanh.f32 %v1664_v47  ;;  %v1670_v2 = vmul.f32 0.5, %v1606_v50  ;;  %v1609_v61 = vadd.f32 %v3483_v3, %v3562_v44 }
 0x2d9   : > { %v2729_v45 = vpop.eup %2728  ;;  %2746 = vtanh.f32 %v1927_v62  ;;  %1975 = vst [vmem:[#allocation2 + $0x20] sm:$0xff] %v1927_v62  ;;  %2007 = vst [vmem:[%s3272_s12 + $0x40] sm:$0xff] %v1927_v62  ;;  %v1784_v48 = vmul.f32 0.5, %v2727_v39  ;;  %v3619_v15 = vpop.f32.mrb[40].mxu0  ;;  %v1671_v26 = vmul.f32 0.5, %v1607_v56  ;;  %v1781_v44 = vmul.f32 0.5, %v3574_v55 }
 0x2da   : > { %1989 = vst [vmem:[#allocation3 + $0x10] sm:$0xff] %v1957_v27  ;;  %2021 = vst [vmem:[%s3272_s12 + $0x28] sm:$0xff] %v1957_v27  ;;  %v1786_v54 = vmul.f32 0.5, %v2729_v45  ;;  %2748 = vtanh.f32 %v1666_v22  ;;  %v3621_v17 = vpop.f32.mrb[40].mxu1  ;;  %v3625_v53 = vpop.f32.mrb[41].mxu0  ;;  %v1673_v19 = vmul.f32 0.5, %v1609_v61 }
 0x2db   : > { %v2731_v57 = vpop.eup %2730  ;;  %v1848_v58 = vadd.f32 0.5, %v1784_v48  ;;  %2750 = vtanh.f32 %v1667_v8  ;;  %v3627_v0 = vpop.f32.mrb[41].mxu1 }
 0x2dc   : > { %v2733_v5 = vpop.eup %2732  ;;  %v1958_v33 = vmul.f32 %v2731_v57, %v1841_v13  ;;  %v1850_v9 = vadd.f32 0.5, %v1786_v54  ;;  %2752 = vtanh.f32 %v1669_v52  ;;  %v1608_v13 = vadd.f32 %v3485_v4, %v3568_v43 }
 0x2dd   : > { %v3629_v41 = vpop.eup %2734  ;;  %v1912_v46 = vmul.f32 %v3368_v60, %v1848_v58  ;;  %v1787_v16 = vmul.f32 0.5, %v2733_v5  ;;  %2754 = vtanh.f32 %v1668_v14  ;;  %v3636_v22 = vpop.f32.mrb[42].mxu0  ;;  %v1610_v60 = vadd.f32 %v3487_v34, %v3570_v6 }
 0x2de   : > { %v2737_v49 = vpop.eup %2736  ;;  %1990 = vst [vmem:[#allocation3 + $0x18] sm:$0xff] %v1958_v33  ;;  %2022 = vst [vmem:[%s3272_s12 + $0x38] sm:$0xff] %v1958_v33  ;;  %v1896_v47 = vmul.f32 %v1850_v9, %v1847_v10  ;;  %2756 = vtanh.f32 %v1670_v2  ;;  %v3638_v23 = vpop.f32.mrb[42].mxu1  ;;  %v1672_v48 = vmul.f32 0.5, %v1608_v13  ;;  %v1845_v54 = vadd.f32 0.5, %v1781_v44 }
 0x2df   : > { %v2739_v25 = vpop.eup %2738  ;;  %v1788_v62 = vmul.f32 0.5, %v2737_v49  ;;  %2758 = vtanh.f32 %v1671_v26  ;;  %v3642_v21 = vpop.f32.mrb[43].mxu0  ;;  %v1851_v27 = vadd.f32 0.5, %v1787_v16  ;;  %v1674_v52 = vmul.f32 0.5, %v1610_v60 }
 0x2e0   : > { %v3644_v39 = vpop.f32.mrb[43].mxu1  ;;  %v2741_v55 = vpop.eup %2740  ;;  %v1928_v10 = vadd.f32 %v1912_v46, %v1896_v47  ;;  %v1790_v8 = vmul.f32 0.5, %v2739_v25  ;;  %2760 = vtanh.f32 %v1673_v19  ;;  %v1611_v14 = vadd.f32 %v3481_v1, %v3584_v59 }
 0x2e1   : > { %v3646_v43 = vpop.eup %2742  ;;  %v1852_v7 = vadd.f32 0.5, %v1788_v62  ;;  %v1791_v45 = vmul.f32 0.5, %v2741_v55  ;;  %v3651_v56 = vpop.f32.mrb[44].mxu0  ;;  %v1785_v46 = vmul.f32 0.5, %v3596_v20  ;;  %v1612_v62 = vadd.f32 %v3485_v4, %v3590_v11 }
 0x2e2   : > { %v2745_v50 = vpop.eup %2744  ;;  %2762 = vtanh.f32 %v1928_v10  ;;  %1976 = vst [vmem:[#allocation2 + $0x28] sm:$0xff] %v1928_v10  ;;  %2008 = vst [vmem:[%s3272_s12 + $0x50] sm:$0xff] %v1928_v10  ;;  %v1854_v6 = vadd.f32 0.5, %v1790_v8  ;;  %v3653_v57 = vpop.f32.mrb[44].mxu1  ;;  %v1675_v47 = vmul.f32 0.5, %v1611_v14  ;;  %v1614_v60 = vadd.f32 %v3487_v34, %v3592_v40 }
 0x2e3   : > { %v2747_v58 = vpop.eup %2746  ;;  %v1913_v2 = vmul.f32 %v1852_v7, %v3382_v18  ;;  %v1792_v61 = vmul.f32 0.5, %v2745_v50  ;;  %2764 = vtanh.f32 %v1672_v48  ;;  %v3656_v5 = vpop.f32.mrb[45].mxu0  ;;  %v1855_v19 = vadd.f32 0.5, %v1791_v45 }
 0x2e4   : > { %v3658_v33 = vpop.f32.mrb[45].mxu1  ;;  %v2749_v9 = vpop.eup %2748  ;;  %v1959_v26 = vmul.f32 %v2747_v58, %v1845_v54  ;;  %v1897_v16 = vmul.f32 %v1854_v6, %v1851_v27  ;;  %2766 = vtanh.f32 %v1674_v52  ;;  %v1789_v27 = vmul.f32 0.5, %v3629_v41 }
 0x2e5   : > { %v2751_v59 = vpop.eup %2750  ;;  %v1856_v49 = vadd.f32 0.5, %v1792_v61  ;;  %v1794_v44 = vmul.f32 0.5, %v2749_v9  ;;  %v3666_v20 = vpop.f32.mrb[46].mxu0  ;;  %2768 = vtanh.f32 %v1675_v47  ;;  %v1613_v40 = vadd.f32 %v3483_v3, %v3586_v63 }
 0x2e6   : > { %v2753_v13 = vpop.eup %2752  ;;  %1991 = vst [vmem:[#allocation3 + $0x20] sm:$0xff] %v1959_v26  ;;  %2023 = vst [vmem:[%s3272_s12 + $0x48] sm:$0xff] %v1959_v26  ;;  %v1929_v18 = vadd.f32 %v1913_v2, %v1897_v16  ;;  %v1795_v25 = vmul.f32 0.5, %v2751_v59  ;;  %v3668_v55 = vpop.f32.mrb[46].mxu1  ;;  %v1676_v14 = vmul.f32 0.5, %v1612_v62  ;;  %v1849_v58 = vadd.f32 0.5, %v1785_v46 }
 0x2e7   : > { %v2755_v10 = vpop.eup %2754  ;;  %v1914_v8 = vmul.f32 %v3380_v12, %v1856_v49  ;;  %v1858_v7 = vadd.f32 0.5, %v1794_v44  ;;  %v3672_v45 = vpop.f32.mrb[47].mxu0  ;;  %v1678_v9 = vmul.f32 0.5, %v1614_v60  ;;  %v1853_v26 = vadd.f32 0.5, %v1789_v27 }
 0x2e8   : > { %v3674_v48 = vpop.f32.mrb[47].mxu1  ;;  %v2757_v52 = vpop.eup %2756  ;;  %2770 = vtanh.f32 %v1929_v18  ;;  %1977 = vst [vmem:[#allocation2 + $0x30] sm:$0xff] %v1929_v18  ;;  %2009 = vst [vmem:[%s3272_s12 + $0x60] sm:$0xff] %v1929_v18  ;;  %v1796_v11 = vmul.f32 0.5, %v2755_v10  ;;  %v1859_v6 = vadd.f32 0.5, %v1795_v25  ;;  %v1793_v44 = vmul.f32 0.5, %v3646_v43 }
 0x2e9   : > { %v2759_v50 = vpop.eup %2758  ;;  %v1898_v54 = vmul.f32 %v1858_v7, %v1855_v19  ;;  %v1798_v41 = vmul.f32 0.5, %v2757_v52  ;;  %2772 = vtanh.f32 %v1676_v14  ;;  %v1615_v19 = vadd.f32 %v3481_v1, %v3601_v51 }
 0x2ea   : > { %v2761_v12 = vpop.eup %2760  ;;  %v1860_v2 = vadd.f32 0.5, %v1796_v11  ;;  %v1799_v61 = vmul.f32 0.5, %v2759_v50  ;;  %2774 = vtanh.f32 %v1678_v9  ;;  %v1677_v25 = vmul.f32 0.5, %v1613_v40 }
 0x2eb   : > { %v1930_v16 = vadd.f32 %v1914_v8, %v1898_v54  ;;  %v1862_v59 = vadd.f32 0.5, %v1798_v41  ;;  %v1679_v27 = vmul.f32 0.5, %v1615_v19  ;;  %v1618_v51 = vadd.f32 %v3487_v34, %v3609_v31 }
 0x2ec   : > { %v2763_v49 = vpop.eup %2762  ;;  %v1915_v63 = vmul.f32 %v1860_v2, %v3390_v30  ;;  %v1863_v60 = vadd.f32 0.5, %v1799_v61  ;;  %v1616_v30 = vadd.f32 %v3485_v4, %v3607_v29  ;;  %v1619_v7 = vadd.f32 %v3481_v1, %v3619_v15 }
 0x2ed   : > { %v2765_v47 = vpop.eup %2764  ;;  %v1960_v46 = vmul.f32 %v2763_v49, %v1849_v58  ;;  %2776 = vtanh.f32 %v1930_v16  ;;  %1978 = vst [vmem:[#allocation2 + $0x38] sm:$0xff] %v1930_v16  ;;  %2010 = vst [vmem:[%s3272_s12 + $0x70] sm:$0xff] %v1930_v16  ;;  %v1899_v18 = vmul.f32 %v1862_v59, %v1859_v6  ;;  %v1797_v52 = vmul.f32 0.5, %v2753_v13 }
 0x2ee   : > { %v2767_v62 = vpop.eup %2766  ;;  %v1800_v10 = vmul.f32 0.5, %v2765_v47  ;;  %2778 = vtanh.f32 %v1679_v27  ;;  %v1680_v40 = vmul.f32 0.5, %v1616_v30  ;;  %v1682_v29 = vmul.f32 0.5, %v1618_v51 }
 0x2ef   : > { %1992 = vst [vmem:[#allocation3 + $0x28] sm:$0xff] %v1960_v46  ;;  %2024 = vst [vmem:[%s3272_s12 + $0x58] sm:$0xff] %v1960_v46  ;;  %v1931_v43 = vadd.f32 %v1915_v63, %v1899_v18  ;;  %v1802_v8 = vmul.f32 0.5, %v2767_v62  ;;  %v2769_v50 = vpop.eup %2768  ;;  %v1683_v6 = vmul.f32 0.5, %v1619_v7  ;;  %v1617_v31 = vadd.f32 %v3483_v3, %v3603_v42 }
 0x2f0   : > { %v1864_v11 = vadd.f32 0.5, %v1800_v10  ;;  %v1803_v58 = vmul.f32 0.5, %v2769_v50  ;;  %v1620_v2 = vadd.f32 %v3485_v4, %v3625_v53  ;;  %v1857_v61 = vadd.f32 0.5, %v1793_v44 }
 0x2f1   : > { %2780 = vtanh.f32 %v1931_v43  ;;  %1979 = vst [vmem:[#allocation2 + $0x40] sm:$0xff] %v1931_v43  ;;  %2011 = vst [vmem:[%s3272_s12 + $0x80] sm:$0xff] %v1931_v43  ;;  %v1866_v54 = vadd.f32 0.5, %v1802_v8  ;;  %v1622_v9 = vadd.f32 %v3487_v34, %v3627_v0  ;;  %v1623_v53 = vadd.f32 %v3481_v1, %v3636_v22 }
 0x2f2   : > { %v2771_v41 = vpop.eup %2770  ;;  %v1916_v14 = vmul.f32 %v3388_v24, %v1864_v11  ;;  %2782 = vtanh.f32 %v1677_v25  ;;  %v1861_v24 = vadd.f32 0.5, %v1797_v52  ;;  %v1684_v49 = vmul.f32 0.5, %v1620_v2 }
 0x2f3   : > { %v1961_v15 = vmul.f32 %v2771_v41, %v1853_v26  ;;  %v1900_v13 = vmul.f32 %v1866_v54, %v1863_v60  ;;  %2784 = vtanh.f32 %v1680_v40  ;;  %v2773_v16 = vpop.eup %2772  ;;  %v1801_v26 = vmul.f32 0.5, %v2761_v12 }
 0x2f4   : > { %2786 = vtanh.f32 %v1682_v29  ;;  %v2775_v42 = vpop.eup %2774  ;;  %v1804_v63 = vmul.f32 0.5, %v2773_v16  ;;  %v1686_v19 = vmul.f32 0.5, %v1622_v9  ;;  %v1867_v0 = vadd.f32 0.5, %v1803_v58 }
 0x2f5   : > { %1993 = vst [vmem:[#allocation3 + $0x30] sm:$0xff] %v1961_v15  ;;  %2025 = vst [vmem:[%s3272_s12 + $0x68] sm:$0xff] %v1961_v15  ;;  %v1932_v59 = vadd.f32 %v1916_v14, %v1900_v13  ;;  %2788 = vtanh.f32 %v1683_v6  ;;  %v1806_v47 = vmul.f32 0.5, %v2775_v42  ;;  %v1681_v46 = vmul.f32 0.5, %v1617_v31 }
 0x2f6   : > { %v1868_v25 = vadd.f32 0.5, %v1804_v63  ;;  %v1687_v62 = vmul.f32 0.5, %v1623_v53  ;;  %v1621_v12 = vadd.f32 %v3483_v3, %v3621_v17  ;;  %v1624_v22 = vadd.f32 %v3485_v4, %v3642_v21 }
 0x2f7   : > { %v2777_v44 = vpop.eup %2776  ;;  %2790 = vtanh.f32 %v1932_v59  ;;  %1980 = vst [vmem:[#allocation2 + $0x48] sm:$0xff] %v1932_v59  ;;  %2012 = vst [vmem:[%s3272_s12 + $0x90] sm:$0xff] %v1932_v59  ;;  %v1870_v60 = vadd.f32 0.5, %v1806_v47  ;;  %v1626_v30 = vadd.f32 %v3487_v34, %v3644_v39  ;;  %v1627_v43 = vadd.f32 %v3481_v1, %v3651_v56 }
 0x2f8   : > { %v1962_v18 = vmul.f32 %v2777_v44, %v1857_v61  ;;  %2792 = vtanh.f32 %v1684_v49  ;;  %v2779_v10 = vpop.eup %2778  ;;  %v1917_v27 = vmul.f32 %v1868_v25, %v3398_v35  ;;  %v1688_v7 = vmul.f32 0.5, %v1624_v22 }
 0x2f9   : > { %2794 = vtanh.f32 %v1686_v19  ;;  %v1901_v51 = vmul.f32 %v1870_v60, %v1867_v0  ;;  %v1807_v17 = vmul.f32 0.5, %v2779_v10  ;;  %v1690_v21 = vmul.f32 0.5, %v1626_v30 }
 0x2fa   : > { %1994 = vst [vmem:[#allocation3 + $0x38] sm:$0xff] %v1962_v18  ;;  %2026 = vst [vmem:[%s3272_s12 + $0x78] sm:$0xff] %v1962_v18  ;;  %2796 = vtanh.f32 %v1687_v62  ;;  %v1691_v40 = vmul.f32 0.5, %v1627_v43  ;;  %v1865_v35 = vadd.f32 0.5, %v1801_v26  ;;  %v1685_v29 = vmul.f32 0.5, %v1621_v12 }
 0x2fb   : > { %v2781_v8 = vpop.eup %2780  ;;  %2798 = vtanh.f32 %v1681_v46  ;;  %v1933_v54 = vadd.f32 %v1917_v27, %v1901_v51  ;;  %v1625_v6 = vadd.f32 %v3483_v3, %v3638_v23  ;;  %v1628_v41 = vadd.f32 %v3485_v4, %v3656_v5 }
 0x2fc   : > { %v2783_v52 = vpop.eup %2782  ;;  %v1963_v11 = vmul.f32 %v2781_v8, %v1861_v24  ;;  %2800 = vtanh.f32 %v1688_v7  ;;  %v1871_v58 = vadd.f32 0.5, %v1807_v17  ;;  %v1630_v15 = vadd.f32 %v3487_v34, %v3658_v33 }
 0x2fd   : > { %v2785_v50 = vpop.eup %2784  ;;  %2802 = vtanh.f32 %v1690_v21  ;;  %1981 = vst [vmem:[#allocation2 + $0x50] sm:$0xff] %v1933_v54  ;;  %2013 = vst [vmem:[%s3272_s12 + $0xa0] sm:$0xff] %v1933_v54  ;;  %v1692_v61 = vmul.f32 0.5, %v1628_v41  ;;  %v1805_v16 = vmul.f32 0.5, %v2783_v52  ;;  %v1689_v42 = vmul.f32 0.5, %v1625_v6 }
 0x2fe   : > { %v2787_v39 = vpop.eup %2786  ;;  %1995 = vst [vmem:[#allocation3 + $0x40] sm:$0xff] %v1963_v11  ;;  %2027 = vst [vmem:[%s3272_s12 + $0x88] sm:$0xff] %v1963_v11  ;;  %v1808_v56 = vmul.f32 0.5, %v2785_v50  ;;  %2804 = vtanh.f32 %v1933_v54  ;;  %v1694_v24 = vmul.f32 0.5, %v1630_v15  ;;  %v1629_v33 = vadd.f32 %v3483_v3, %v3653_v57 }
 0x2ff   : > { %v2789_v14 = vpop.eup %2788  ;;  %v1810_v31 = vmul.f32 0.5, %v2787_v39  ;;  %2806 = vtanh.f32 %v1691_v40  ;;  %v1631_v47 = vadd.f32 %v3481_v1, %v3666_v20  ;;  %v1634_v62 = vadd.f32 %v3487_v34, %v3674_v48 }
 0x300   : > { %v1872_v13 = vadd.f32 0.5, %v1808_v56  ;;  %v1811_v2 = vmul.f32 0.5, %v2789_v14  ;;  %2808 = vtanh.f32 %v1685_v29  ;;  %v1869_v27 = vadd.f32 0.5, %v1805_v16 }
 0x301   : > { %v2791_v9 = vpop.eup %2790  ;;  %v1874_v23 = vadd.f32 0.5, %v1810_v31  ;;  %2810 = vtanh.f32 %v1692_v61  ;;  %v1695_v12 = vmul.f32 0.5, %v1631_v47  ;;  %v1693_v48 = vmul.f32 0.5, %v1629_v33 }
 0x302   : > { %v2793_v5 = vpop.eup %2792  ;;  %v1964_v59 = vmul.f32 %v2791_v9, %v1865_v35  ;;  %v1918_v49 = vmul.f32 %v3396_v32, %v1872_v13  ;;  %2812 = vtanh.f32 %v1694_v24  ;;  %v1875_v44 = vadd.f32 0.5, %v1811_v2 }
 0x303   : > { %v2795_v26 = vpop.eup %2794  ;;  %v1902_v63 = vmul.f32 %v1874_v23, %v1871_v58  ;;  %v1812_v19 = vmul.f32 0.5, %v2793_v5  ;;  %v1632_v32 = vadd.f32 %v3485_v4, %v3672_v45  ;;  %2814 = vtanh.f32 %v1689_v42 }
 0x304   : > { %v2797_v53 = vpop.eup %2796  ;;  %1996 = vst [vmem:[#allocation3 + $0x48] sm:$0xff] %v1964_v59  ;;  %2028 = vst [vmem:[%s3272_s12 + $0x98] sm:$0xff] %v1964_v59  ;;  %v1814_v0 = vmul.f32 0.5, %v2795_v26  ;;  %v1698_v8 = vmul.f32 0.5, %v1634_v62  ;;  %v1633_v56 = vadd.f32 %v3483_v3, %v3668_v55 }
 0x305   : > { %v1934_v46 = vadd.f32 %v1918_v49, %v1902_v63  ;;  %v1876_v18 = vadd.f32 0.5, %v1812_v19  ;;  %v1815_v25 = vmul.f32 0.5, %v2797_v53  ;;  %v2799_v57 = vpop.eup %2798  ;;  %v1696_v1 = vmul.f32 0.5, %v1632_v32 }
 0x306   : > { %v1878_v60 = vadd.f32 0.5, %v1814_v0  ;;  %v2801_v22 = vpop.eup %2800  ;;  %v1809_v50 = vmul.f32 0.5, %v2799_v57  ;;  %v1697_v9 = vmul.f32 0.5, %v1633_v56 }
 0x307   : > { %2816 = vtanh.f32 %v1934_v46  ;;  %1982 = vst [vmem:[#allocation2 + $0x58] sm:$0xff] %v1934_v46  ;;  %2014 = vst [vmem:[%s3272_s12 + $0xb0] sm:$0xff] %v1934_v46  ;;  %v1919_v10 = vmul.f32 %v1876_v18, %v3406_v28  ;;  %v2803_v20 = vpop.eup %2802  ;;  %v1816_v45 = vmul.f32 0.5, %v2801_v22  ;;  %v1879_v43 = vadd.f32 0.5, %v1815_v25 }
 0x308   : > { %v1903_v4 = vmul.f32 %v1878_v60, %v1875_v44  ;;  %2818 = vtanh.f32 %v1695_v12  ;;  %v2805_v30 = vpop.eup %2804  ;;  %v1818_v34 = vmul.f32 0.5, %v2803_v20  ;;  %v1873_v15 = vadd.f32 0.5, %v1809_v50 }
 0x309   : > { %v2807_v51 = vpop.eup %2806  ;;  %v1965_v17 = vmul.f32 %v2805_v30, %v1869_v27  ;;  %v1880_v52 = vadd.f32 0.5, %v1816_v45  ;;  %2820 = vtanh.f32 %v1696_v1 }
 0x30a   : > { %v1935_v7 = vadd.f32 %v1919_v10, %v1903_v4  ;;  %v2809_v11 = vpop.eup %2808  ;;  %v1882_v28 = vadd.f32 0.5, %v1818_v34  ;;  %v1819_v21 = vmul.f32 0.5, %v2807_v51  ;;  %2822 = vtanh.f32 %v1698_v8 }
 0x30b   : > { %v2811_v40 = vpop.eup %2810  ;;  %1997 = vst [vmem:[#allocation3 + $0x50] sm:$0xff] %v1965_v17  ;;  %2029 = vst [vmem:[%s3272_s12 + $0xa8] sm:$0xff] %v1965_v17  ;;  %v1920_v35 = vmul.f32 %v3404_v36, %v1880_v52  ;;  %v1813_v61 = vmul.f32 0.5, %v2809_v11 }
 0x30c   : > { %2824 = vtanh.f32 %v1935_v7  ;;  %1983 = vst [vmem:[#allocation2 + $0x60] sm:$0xff] %v1935_v7  ;;  %2015 = vst [vmem:[%s3272_s12 + $0xc0] sm:$0xff] %v1935_v7  ;;  %v2813_v54 = vpop.eup %2812  ;;  %v1904_v29 = vmul.f32 %v1882_v28, %v1879_v43  ;;  %v1820_v39 = vmul.f32 0.5, %v2811_v40  ;;  %v1883_v6 = vadd.f32 0.5, %v1819_v21 }
 0x30d   : > { %2826 = vtanh.f32 %v1693_v48  ;;  %v1822_v41 = vmul.f32 0.5, %v2813_v54  ;;  %v2815_v31 = vpop.eup %2814  ;;  %v1877_v49 = vadd.f32 0.5, %v1813_v61 }
 0x30e   : > { %v1936_v14 = vadd.f32 %v1920_v35, %v1904_v29  ;;  %v1884_v58 = vadd.f32 0.5, %v1820_v39  ;;  %v1817_v63 = vmul.f32 0.5, %v2815_v31 }
 0x30f   : > { %v1886_v13 = vadd.f32 0.5, %v1822_v41 }
 0x310   : > { %2828 = vtanh.f32 %v1936_v14  ;;  %1984 = vst [vmem:[#allocation2 + $0x68] sm:$0xff] %v1936_v14  ;;  %2016 = vst [vmem:[%s3272_s12 + $0xd0] sm:$0xff] %v1936_v14  ;;  %v1921_v36 = vmul.f32 %v1884_v58, %v3414_v38  ;;  %v1881_v32 = vadd.f32 0.5, %v1817_v63 }
 0x311   : > { %v2817_v2 = vpop.eup %2816  ;;  %v1905_v55 = vmul.f32 %v1886_v13, %v1883_v6  ;;  %2830 = vtanh.f32 %v1697_v9 }
 0x312   : > { %v2819_v16 = vpop.eup %2818  ;;  %v1966_v3 = vmul.f32 %v2817_v2, %v1873_v15 }
 0x313   : > { %v1823_v23 = vmul.f32 0.5, %v2819_v16  ;;  %v2821_v24 = vpop.eup %2820  ;;  %v1937_v5 = vadd.f32 %v1921_v36, %v1905_v55 }
 0x314   : > { %1998 = vst [vmem:[#allocation3 + $0x58] sm:$0xff] %v1966_v3  ;;  %2030 = vst [vmem:[%s3272_s12 + $0xb8] sm:$0xff] %v1966_v3  ;;  %v2823_v59 = vpop.eup %2822  ;;  %v1824_v42 = vmul.f32 0.5, %v2821_v24 }
 0x315   : > { %2832 = vtanh.f32 %v1937_v5  ;;  %1985 = vst [vmem:[#allocation2 + $0x70] sm:$0xff] %v1937_v5  ;;  %2017 = vst [vmem:[%s3272_s12 + $0xe0] sm:$0xff] %v1937_v5  ;;  %v1887_v38 = vadd.f32 0.5, %v1823_v23  ;;  %v1826_v19 = vmul.f32 0.5, %v2823_v59 }
 0x316   : > { %v2825_v26 = vpop.eup %2824  ;;  %v1888_v53 = vadd.f32 0.5, %v1824_v42 }
 0x317   : > { %v1967_v33 = vmul.f32 %v2825_v26, %v1877_v49  ;;  %v2827_v44 = vpop.eup %2826  ;;  %v1890_v0 = vadd.f32 0.5, %v1826_v19 }
 0x318   : > { %v1922_v47 = vmul.f32 %v3412_v37, %v1888_v53  ;;  %v1821_v25 = vmul.f32 0.5, %v2827_v44 }
 0x319   : > { %1999 = vst [vmem:[#allocation3 + $0x60] sm:$0xff] %v1967_v33  ;;  %2031 = vst [vmem:[%s3272_s12 + $0xc8] sm:$0xff] %v1967_v33  ;;  %v1906_v46 = vmul.f32 %v1890_v0, %v1887_v38 }
 0x31a   : > { %v2829_v18 = vpop.eup %2828  ;;  %v1885_v12 = vadd.f32 0.5, %v1821_v25 }
 0x31b   : > { %v1968_v62 = vmul.f32 %v2829_v18, %v1881_v32  ;;  %v1938_v57 = vadd.f32 %v1922_v47, %v1906_v46  ;;  %v2831_v60 = vpop.eup %2830 }
 0x31c   : > { %v1825_v37 = vmul.f32 0.5, %v2831_v60 }
 0x31d   : > { %2000 = vst [vmem:[#allocation3 + $0x68] sm:$0xff] %v1968_v62  ;;  %2032 = vst [vmem:[%s3272_s12 + $0xd8] sm:$0xff] %v1968_v62  ;;  %2834 = vtanh.f32 %v1938_v57 }
 0x31e   : > { %1986 = vst [vmem:[#allocation2 + $0x78] sm:$0xff] %v1938_v57  ;;  %2018 = vst [vmem:[%s3272_s12 + $0xf0] sm:$0xff] %v1938_v57  ;;  %v1889_v1 = vadd.f32 0.5, %v1825_v37 }
 0x31f   : > { %v2833_v22 = vpop.eup %2832 }
 0x320   : > { %v1969_v10 = vmul.f32 %v2833_v22, %v1885_v12 }
 0x322   : > { %2001 = vst [vmem:[#allocation3 + $0x70] sm:$0xff] %v1969_v10  ;;  %2033 = vst [vmem:[%s3272_s12 + $0xe8] sm:$0xff] %v1969_v10 }
 0x327   : > { %v2835_v20 = vpop.eup %2834 }
 0x328   : > { %v1970_v27 = vmul.f32 %v2835_v20, %v1889_v1 }
 0x32a   : > { %2002 = vst [vmem:[#allocation3 + $0x78] sm:$0xff] %v1970_v27  ;;  %2034 = vst [vmem:[%s3272_s12 + $0xf8] sm:$0xff] %v1970_v27 }
 0x32b PF: > { %p21_p0 = scmp.ge.s32.totalorder %s3143_s20, 6   ;;  %s3785_s24 = smov %s2990_s25 }
 0x32c   : > { %s3786_s25 = smov %s2994_s26  ;;  %s3787_s26 = smov %s3154_s8 }
 0x32d   : > { %s3788_s27 = smov %s3143_s20  ;;  %23 = sbr.rel (!%p21_p0) target bundleno = 8 (0x8), region = 113 }
 0x334   :  { %2059 = vsyncpa [#allocation5], 1 }
 0x335   :  { %2061 = vsyncpa [#allocation5 + $0x1], 1 }
 0x336   :  { %2062 = vsyncpa [#allocation7], 1 }
 0x337   :  { %2064 = vsyncpa [#allocation7 + $0x1], 1 }
 0x338   :  { %2065 = vsyncpa [#allocation10], 1 }

</bundles_post_ra>
